<compile_context>
chip_gen: v6e
topology: v6e:2x2x1
jax: 0.10.0
libtpu: 0.0.40
codegen_flags: <defaults>
</compile_context>

<pallas_src>
import jax
import jax.numpy as jnp
from jax import lax
from jax.experimental import pallas as pl
from jax.experimental.pallas import tpu as pltpu  # noqa: F401

_SUBLANE = 8


def _round_up(x, m):
    return ((x + m - 1) // m) * m


def make_state_encoder_kernel(L, S, B, Bp, H, dinps):
    """Fused multi-layer GRU kernel for static (L, S, B, Bp, H, dinps)."""

    def kernel(x_ref, *rest):
        w_refs = rest[:L]           # one packed weight ref per layer
        out_ref = rest[L]           # (B, H)

        seq_in = x_ref[...]         # (S*Bp, dinps[0]) time-major, batch-padded
        h = None

        for l in range(L):
            W = w_refs[l]
            dinp = dinps[l]
            o = dinp                # start of the per-gate W_hh section

            # Packed layer layout (all ref row-slices are sublane aligned):
            #   rows [0, dinp)            : W_ih^T (gates packed along 3H lanes)
            #   rows [o,      o +  H)     : W_hr^T   (lanes [0, H))
            #   rows [o +  H, o + 2H)     : W_hz^T   (lanes [0, H))
            #   rows [o + 2H, o + 3H)     : W_hn^T   (lanes [0, H))
            #   row   o + 3H              : b_ih + [b_hr | b_hz | 0]
            #   row   o + 3H + 1          : b_hn     (lanes [0, H))
            wih = W[0:dinp, :]                                   # (dinp, 3H)
            whh_r = W[o:o + H, 0:H]                              # (H, H)
            whh_z = W[o + H:o + 2 * H, 0:H]                      # (H, H)
            whh_n = W[o + 2 * H:o + 3 * H, 0:H]                  # (H, H)
            bias = W[o + 3 * H:o + 3 * H + 1, :]                 # (1, 3H)
            bhn = W[o + 3 * H + 1:o + 3 * H + 2, 0:H]            # (1, H)
            bhn_b = jnp.broadcast_to(bhn, (Bp, H))               # hoisted once

            # Hoisted input projection: one MXU matmul for the whole sequence,
            # split into per-gate arrays once per layer (off the serial path).
            gi_all = jnp.dot(seq_in, wih,
                             preferred_element_type=jnp.float32) + bias
            gi_r = gi_all[:, 0:H]
            gi_z = gi_all[:, H:2 * H]
            gi_n = gi_all[:, 2 * H:3 * H]

            h = jnp.zeros((Bp, H), jnp.float32)
            h_steps = []

            # Statically unrolled recurrence; only h @ W_h* + gate math is
            # sequential.  All row slices are full (8, H) sublane tiles.
            for t in range(S):
                r0 = t * Bp
                gh_r = jnp.dot(h, whh_r, preferred_element_type=jnp.float32)
                gh_z = jnp.dot(h, whh_z, preferred_element_type=jnp.float32)
                gh_n = jnp.dot(h, whh_n, preferred_element_type=jnp.float32)
                r = jax.nn.sigmoid(gi_r[r0:r0 + Bp, :] + gh_r)
                z = jax.nn.sigmoid(gi_z[r0:r0 + Bp, :] + gh_z)
                n = jnp.tanh(gi_n[r0:r0 + Bp, :] + r * (gh_n + bhn_b))
                h = n + z * (h - n)
                if l < L - 1:
                    h_steps.append(h)

            if l < L - 1:
                # Next layer's input stays in vregs: tile-aligned concat of
                # S whole (Bp, H) blocks, no VMEM round trip.
                seq_in = jnp.concatenate(h_steps, axis=0)        # (S*Bp, H)

        out_ref[...] = h[:B, :]     # last timestep of the top layer

    return kernel


def pack_state_encoder_params(params):
    """Packs per-layer (wih_t, whh_t, bih, bhh) into one f32 array per layer."""
    H = params[0][1].shape[0]
    assert H % _SUBLANE == 0, "hidden_size must be a multiple of 8"
    packed = []
    for (wih_t, whh_t, bih, bhh) in params:
        din = wih_t.shape[0]
        dinp = _round_up(din, _SUBLANE)
        rows = dinp + 3 * H + _SUBLANE
        W = jnp.zeros((rows, 3 * H), jnp.float32)
        W = W.at[:din, :].set(wih_t)
        W = W.at[dinp:dinp + H, :H].set(whh_t[:, :H])
        W = W.at[dinp + H:dinp + 2 * H, :H].set(whh_t[:, H:2 * H])
        W = W.at[dinp + 2 * H:dinp + 3 * H, :H].set(whh_t[:, 2 * H:])
        bias_comb = jnp.concatenate(
            [bih[0, :2 * H] + bhh[0, :2 * H], bih[0, 2 * H:]], axis=0)
        W = W.at[dinp + 3 * H, :].set(bias_comb)          # b_ih + [b_hr|b_hz|0]
        W = W.at[dinp + 3 * H + 1, :H].set(bhh[0, 2 * H:])  # b_hn
        packed.append(W)
    return tuple(packed)


def _state_encoder_forward_impl(X, packed):
    """X: (B, S, state_num) batch-first; packed: tuple from pack_state_encoder_params.

    Returns (B, H) = last timestep of the top GRU layer (h0 = zeros).
    """
    B, S, D0 = X.shape
    L = len(packed)
    H = packed[0].shape[1] // 3
    Bp = _round_up(B, _SUBLANE)
    Dp0 = _round_up(D0, _SUBLANE)
    dinps = tuple([Dp0] + [H] * (L - 1))

    # Time-major, batch padded to a sublane tile, feature dim padded to the
    # packed-weight contraction width.  Row t*Bp + b <-> (timestep t, batch b).
    xt = jnp.transpose(X, (1, 0, 2)).astype(jnp.float32)          # (S, B, D0)
    xt = jnp.pad(xt, ((0, 0), (0, Bp - B), (0, Dp0 - D0)))        # (S, Bp, Dp0)
    x_flat = xt.reshape(S * Bp, Dp0)

    kernel = make_state_encoder_kernel(L, S, B, Bp, H, dinps)
    return pl.pallas_call(
        kernel,
        out_shape=jax.ShapeDtypeStruct((B, H), jnp.float32),
    )(x_flat, *packed)


state_encoder_forward = jax.jit(_state_encoder_forward_impl)


def init_state_encoder_params(key, state_num, num_layers, hidden_size):
    """Deterministic init matching PyTorch GRU parameter shapes.

    Per layer l (transposed layout): weight_ih^T (D_l, 3H), weight_hh^T (H, 3H),
    bias_ih (1, 3H), bias_hh (1, 3H).  Gate order [r|z|n].
    """
    params = []
    bound = 1.0 / jnp.sqrt(jnp.float32(hidden_size))
    for l in range(num_layers):
        d_in = state_num if l == 0 else hidden_size
        key, k1, k2, k3, k4 = jax.random.split(key, 5)
        wih_t = jax.random.uniform(k1, (d_in, 3 * hidden_size), jnp.float32,
                                   -bound, bound)
        whh_t = jax.random.uniform(k2, (hidden_size, 3 * hidden_size),
                                   jnp.float32, -bound, bound)
        bih = jax.random.uniform(k3, (1, 3 * hidden_size), jnp.float32,
                                 -bound, bound)
        bhh = jax.random.uniform(k4, (1, 3 * hidden_size), jnp.float32,
                                 -bound, bound)
        params.append((wih_t, whh_t, bih, bhh))
    return params


def state_encoder_reference(X, params):
    """Pure-JAX reference (lax.scan) for correctness checking."""
    x = jnp.transpose(X, (1, 0, 2))  # (S, B, D)
    H = params[0][1].shape[0]
    for (wih_t, whh_t, bih, bhh) in params:
        B = x.shape[1]

        def step(h, x_t):
            gi = x_t @ wih_t + bih
            gh = h @ whh_t + bhh
            r = jax.nn.sigmoid(gi[:, :H] + gh[:, :H])
            z = jax.nn.sigmoid(gi[:, H:2 * H] + gh[:, H:2 * H])
            n = jnp.tanh(gi[:, 2 * H:] + r * gh[:, 2 * H:])
            h_new = (1.0 - z) * n + z * h
            return h_new, h_new

        h0 = jnp.zeros((B, H), jnp.float32)
        _, x = lax.scan(step, h0, x)
    return x[-1]


if __name__ == "__main__":
    # Small shapes consistent with the module: batch=2, seq=8, state_num=4,
    # hidden_size=32, num_layers=2.
    batch, seq_len, state_num = 2, 8, 4
    hidden_size, num_layers = 32, 2

    key = jax.random.PRNGKey(0)
    key_x, key_p = jax.random.split(key)
    X = jax.random.normal(key_x, (batch, seq_len, state_num), jnp.float32)
    params = init_state_encoder_params(key_p, state_num, num_layers,
                                       hidden_size)

    packed = pack_state_encoder_params(params)   # pack once, reuse every call
    out = state_encoder_forward(X, packed)
    out = jax.block_until_ready(out)

    ref = state_encoder_reference(X, params)
    assert out.shape == (batch, hidden_size)
    assert jnp.allclose(out, ref, atol=1e-5, rtol=1e-5), "mismatch vs reference"

    print("KERNEL_OK")
</pallas_src>

<mosaic_0001>
module attributes {stable_mosaic.version = 11 : i64} {
  func.func @kernel(%arg0: memref<64x8xf32, #tpu.memory_space<vmem>>, %arg1: memref<112x96xf32, #tpu.memory_space<vmem>>, %arg2: memref<136x96xf32, #tpu.memory_space<vmem>>, %arg3: memref<2x32xf32, #tpu.memory_space<vmem>>) attributes {dimension_semantics = [], scalar_prefetch = 0 : i64, scratch_operands = 0 : i64, tpu.core_type = #tpu.core_type<tc>} {
    %c0 = arith.constant 0 : index
    %c0_0 = arith.constant 0 : index
    %0 = vector.load %arg0[%c0, %c0_0] : memref<64x8xf32, #tpu.memory_space<vmem>>, vector<64x8xf32>
    %c0_1 = arith.constant 0 : index
    %c0_2 = arith.constant 0 : index
    %1 = vector.load %arg1[%c0_1, %c0_2] : memref<112x96xf32, #tpu.memory_space<vmem>>, vector<8x96xf32>
    %c8 = arith.constant 8 : index
    %c0_3 = arith.constant 0 : index
    %2 = vector.load %arg1[%c8, %c0_3] : memref<112x96xf32, #tpu.memory_space<vmem>>, vector<32x32xf32>
    %c40 = arith.constant 40 : index
    %c0_4 = arith.constant 0 : index
    %3 = vector.load %arg1[%c40, %c0_4] : memref<112x96xf32, #tpu.memory_space<vmem>>, vector<32x32xf32>
    %c72 = arith.constant 72 : index
    %c0_5 = arith.constant 0 : index
    %4 = vector.load %arg1[%c72, %c0_5] : memref<112x96xf32, #tpu.memory_space<vmem>>, vector<32x32xf32>
    %c104 = arith.constant 104 : index
    %c0_6 = arith.constant 0 : index
    %5 = vector.load %arg1[%c104, %c0_6] : memref<112x96xf32, #tpu.memory_space<vmem>>, vector<1x96xf32>
    %c105 = arith.constant 105 : index
    %c0_7 = arith.constant 0 : index
    %6 = vector.load %arg1[%c105, %c0_7] : memref<112x96xf32, #tpu.memory_space<vmem>>, vector<1x32xf32>
    %7 = vector.shape_cast %6 : vector<1x32xf32> to vector<1x32xf32>
    %8 = vector.broadcast %7 : vector<1x32xf32> to vector<8x32xf32>
    %cst = arith.constant dense<0.000000e+00> : vector<64x96xf32>
    %9 = tpu.matmul %0, %1, %cst {dimension_numbers = #tpu.dot_dimension_numbers<[1], [0], [0], [1], [0, 0, 1, 1], [], []>} : vector<64x8xf32>, vector<8x96xf32>, vector<64x96xf32> -> vector<64x96xf32>
    %10 = vector.broadcast %5 : vector<1x96xf32> to vector<64x96xf32>
    %11 = arith.addf %9, %10 : vector<64x96xf32>
    %12 = vector.extract_strided_slice %11 {offsets = [0, 0], sizes = [64, 32], strides = [1, 1]} : vector<64x96xf32> to vector<64x32xf32>
    %13 = vector.extract_strided_slice %11 {offsets = [0, 32], sizes = [64, 32], strides = [1, 1]} : vector<64x96xf32> to vector<64x32xf32>
    %14 = vector.extract_strided_slice %11 {offsets = [0, 64], sizes = [64, 32], strides = [1, 1]} : vector<64x96xf32> to vector<64x32xf32>
    %cst_8 = arith.constant 0.000000e+00 : f32
    %15 = vector.broadcast %cst_8 : f32 to vector<8x32xf32>
    %cst_9 = arith.constant dense<0.000000e+00> : vector<8x32xf32>
    %16 = tpu.matmul %15, %2, %cst_9 {dimension_numbers = #tpu.dot_dimension_numbers<[1], [0], [0], [1], [0, 0, 1, 1], [], []>} : vector<8x32xf32>, vector<32x32xf32>, vector<8x32xf32> -> vector<8x32xf32>
    %cst_10 = arith.constant dense<0.000000e+00> : vector<8x32xf32>
    %17 = tpu.matmul %15, %3, %cst_10 {dimension_numbers = #tpu.dot_dimension_numbers<[1], [0], [0], [1], [0, 0, 1, 1], [], []>} : vector<8x32xf32>, vector<32x32xf32>, vector<8x32xf32> -> vector<8x32xf32>
    %cst_11 = arith.constant dense<0.000000e+00> : vector<8x32xf32>
    %18 = tpu.matmul %15, %4, %cst_11 {dimension_numbers = #tpu.dot_dimension_numbers<[1], [0], [0], [1], [0, 0, 1, 1], [], []>} : vector<8x32xf32>, vector<32x32xf32>, vector<8x32xf32> -> vector<8x32xf32>
    %19 = vector.extract_strided_slice %12 {offsets = [0, 0], sizes = [8, 32], strides = [1, 1]} : vector<64x32xf32> to vector<8x32xf32>
    %20 = arith.addf %19, %16 : vector<8x32xf32>
    %21 = arith.negf %20 : vector<8x32xf32>
    %22 = math.exp %21 : vector<8x32xf32>
    %cst_12 = arith.constant 1.000000e+00 : f32
    %23 = vector.broadcast %cst_12 : f32 to vector<8x32xf32>
    %24 = arith.addf %23, %22 : vector<8x32xf32>
    %25 = arith.divf %23, %24 : vector<8x32xf32>
    %26 = vector.extract_strided_slice %13 {offsets = [0, 0], sizes = [8, 32], strides = [1, 1]} : vector<64x32xf32> to vector<8x32xf32>
    %27 = arith.addf %26, %17 : vector<8x32xf32>
    %28 = arith.negf %27 : vector<8x32xf32>
    %29 = math.exp %28 : vector<8x32xf32>
    %cst_13 = arith.constant 1.000000e+00 : f32
    %30 = vector.broadcast %cst_13 : f32 to vector<8x32xf32>
    %31 = arith.addf %30, %29 : vector<8x32xf32>
    %32 = arith.divf %30, %31 : vector<8x32xf32>
    %33 = vector.extract_strided_slice %14 {offsets = [0, 0], sizes = [8, 32], strides = [1, 1]} : vector<64x32xf32> to vector<8x32xf32>
    %34 = arith.addf %18, %8 : vector<8x32xf32>
    %35 = arith.mulf %25, %34 : vector<8x32xf32>
    %36 = arith.addf %33, %35 : vector<8x32xf32>
    %37 = math.tanh %36 : vector<8x32xf32>
    %38 = arith.subf %15, %37 : vector<8x32xf32>
    %39 = arith.mulf %32, %38 : vector<8x32xf32>
    %40 = arith.addf %37, %39 : vector<8x32xf32>
    %cst_14 = arith.constant dense<0.000000e+00> : vector<8x32xf32>
    %41 = tpu.matmul %40, %2, %cst_14 {dimension_numbers = #tpu.dot_dimension_numbers<[1], [0], [0], [1], [0, 0, 1, 1], [], []>} : vector<8x32xf32>, vector<32x32xf32>, vector<8x32xf32> -> vector<8x32xf32>
    %cst_15 = arith.constant dense<0.000000e+00> : vector<8x32xf32>
    %42 = tpu.matmul %40, %3, %cst_15 {dimension_numbers = #tpu.dot_dimension_numbers<[1], [0], [0], [1], [0, 0, 1, 1], [], []>} : vector<8x32xf32>, vector<32x32xf32>, vector<8x32xf32> -> vector<8x32xf32>
    %cst_16 = arith.constant dense<0.000000e+00> : vector<8x32xf32>
    %43 = tpu.matmul %40, %4, %cst_16 {dimension_numbers = #tpu.dot_dimension_numbers<[1], [0], [0], [1], [0, 0, 1, 1], [], []>} : vector<8x32xf32>, vector<32x32xf32>, vector<8x32xf32> -> vector<8x32xf32>
    %44 = vector.extract_strided_slice %12 {offsets = [8, 0], sizes = [8, 32], strides = [1, 1]} : vector<64x32xf32> to vector<8x32xf32>
    %45 = arith.addf %44, %41 : vector<8x32xf32>
    %46 = arith.negf %45 : vector<8x32xf32>
    %47 = math.exp %46 : vector<8x32xf32>
    %cst_17 = arith.constant 1.000000e+00 : f32
    %48 = vector.broadcast %cst_17 : f32 to vector<8x32xf32>
    %49 = arith.addf %48, %47 : vector<8x32xf32>
    %50 = arith.divf %48, %49 : vector<8x32xf32>
    %51 = vector.extract_strided_slice %13 {offsets = [8, 0], sizes = [8, 32], strides = [1, 1]} : vector<64x32xf32> to vector<8x32xf32>
    %52 = arith.addf %51, %42 : vector<8x32xf32>
    %53 = arith.negf %52 : vector<8x32xf32>
    %54 = math.exp %53 : vector<8x32xf32>
    %cst_18 = arith.constant 1.000000e+00 : f32
    %55 = vector.broadcast %cst_18 : f32 to vector<8x32xf32>
    %56 = arith.addf %55, %54 : vector<8x32xf32>
    %57 = arith.divf %55, %56 : vector<8x32xf32>
    %58 = vector.extract_strided_slice %14 {offsets = [8, 0], sizes = [8, 32], strides = [1, 1]} : vector<64x32xf32> to vector<8x32xf32>
    %59 = arith.addf %43, %8 : vector<8x32xf32>
    %60 = arith.mulf %50, %59 : vector<8x32xf32>
    %61 = arith.addf %58, %60 : vector<8x32xf32>
    %62 = math.tanh %61 : vector<8x32xf32>
    %63 = arith.subf %40, %62 : vector<8x32xf32>
    %64 = arith.mulf %57, %63 : vector<8x32xf32>
    %65 = arith.addf %62, %64 : vector<8x32xf32>
    %cst_19 = arith.constant dense<0.000000e+00> : vector<8x32xf32>
    %66 = tpu.matmul %65, %2, %cst_19 {dimension_numbers = #tpu.dot_dimension_numbers<[1], [0], [0], [1], [0, 0, 1, 1], [], []>} : vector<8x32xf32>, vector<32x32xf32>, vector<8x32xf32> -> vector<8x32xf32>
    %cst_20 = arith.constant dense<0.000000e+00> : vector<8x32xf32>
    %67 = tpu.matmul %65, %3, %cst_20 {dimension_numbers = #tpu.dot_dimension_numbers<[1], [0], [0], [1], [0, 0, 1, 1], [], []>} : vector<8x32xf32>, vector<32x32xf32>, vector<8x32xf32> -> vector<8x32xf32>
    %cst_21 = arith.constant dense<0.000000e+00> : vector<8x32xf32>
    %68 = tpu.matmul %65, %4, %cst_21 {dimension_numbers = #tpu.dot_dimension_numbers<[1], [0], [0], [1], [0, 0, 1, 1], [], []>} : vector<8x32xf32>, vector<32x32xf32>, vector<8x32xf32> -> vector<8x32xf32>
    %69 = vector.extract_strided_slice %12 {offsets = [16, 0], sizes = [8, 32], strides = [1, 1]} : vector<64x32xf32> to vector<8x32xf32>
    %70 = arith.addf %69, %66 : vector<8x32xf32>
    %71 = arith.negf %70 : vector<8x32xf32>
    %72 = math.exp %71 : vector<8x32xf32>
    %cst_22 = arith.constant 1.000000e+00 : f32
    %73 = vector.broadcast %cst_22 : f32 to vector<8x32xf32>
    %74 = arith.addf %73, %72 : vector<8x32xf32>
    %75 = arith.divf %73, %74 : vector<8x32xf32>
    %76 = vector.extract_strided_slice %13 {offsets = [16, 0], sizes = [8, 32], strides = [1, 1]} : vector<64x32xf32> to vector<8x32xf32>
    %77 = arith.addf %76, %67 : vector<8x32xf32>
    %78 = arith.negf %77 : vector<8x32xf32>
    %79 = math.exp %78 : vector<8x32xf32>
    %cst_23 = arith.constant 1.000000e+00 : f32
    %80 = vector.broadcast %cst_23 : f32 to vector<8x32xf32>
    %81 = arith.addf %80, %79 : vector<8x32xf32>
    %82 = arith.divf %80, %81 : vector<8x32xf32>
    %83 = vector.extract_strided_slice %14 {offsets = [16, 0], sizes = [8, 32], strides = [1, 1]} : vector<64x32xf32> to vector<8x32xf32>
    %84 = arith.addf %68, %8 : vector<8x32xf32>
    %85 = arith.mulf %75, %84 : vector<8x32xf32>
    %86 = arith.addf %83, %85 : vector<8x32xf32>
    %87 = math.tanh %86 : vector<8x32xf32>
    %88 = arith.subf %65, %87 : vector<8x32xf32>
    %89 = arith.mulf %82, %88 : vector<8x32xf32>
    %90 = arith.addf %87, %89 : vector<8x32xf32>
    %cst_24 = arith.constant dense<0.000000e+00> : vector<8x32xf32>
    %91 = tpu.matmul %90, %2, %cst_24 {dimension_numbers = #tpu.dot_dimension_numbers<[1], [0], [0], [1], [0, 0, 1, 1], [], []>} : vector<8x32xf32>, vector<32x32xf32>, vector<8x32xf32> -> vector<8x32xf32>
    %cst_25 = arith.constant dense<0.000000e+00> : vector<8x32xf32>
    %92 = tpu.matmul %90, %3, %cst_25 {dimension_numbers = #tpu.dot_dimension_numbers<[1], [0], [0], [1], [0, 0, 1, 1], [], []>} : vector<8x32xf32>, vector<32x32xf32>, vector<8x32xf32> -> vector<8x32xf32>
    %cst_26 = arith.constant dense<0.000000e+00> : vector<8x32xf32>
    %93 = tpu.matmul %90, %4, %cst_26 {dimension_numbers = #tpu.dot_dimension_numbers<[1], [0], [0], [1], [0, 0, 1, 1], [], []>} : vector<8x32xf32>, vector<32x32xf32>, vector<8x32xf32> -> vector<8x32xf32>
    %94 = vector.extract_strided_slice %12 {offsets = [24, 0], sizes = [8, 32], strides = [1, 1]} : vector<64x32xf32> to vector<8x32xf32>
    %95 = arith.addf %94, %91 : vector<8x32xf32>
    %96 = arith.negf %95 : vector<8x32xf32>
    %97 = math.exp %96 : vector<8x32xf32>
    %cst_27 = arith.constant 1.000000e+00 : f32
    %98 = vector.broadcast %cst_27 : f32 to vector<8x32xf32>
    %99 = arith.addf %98, %97 : vector<8x32xf32>
    %100 = arith.divf %98, %99 : vector<8x32xf32>
    %101 = vector.extract_strided_slice %13 {offsets = [24, 0], sizes = [8, 32], strides = [1, 1]} : vector<64x32xf32> to vector<8x32xf32>
    %102 = arith.addf %101, %92 : vector<8x32xf32>
    %103 = arith.negf %102 : vector<8x32xf32>
    %104 = math.exp %103 : vector<8x32xf32>
    %cst_28 = arith.constant 1.000000e+00 : f32
    %105 = vector.broadcast %cst_28 : f32 to vector<8x32xf32>
    %106 = arith.addf %105, %104 : vector<8x32xf32>
    %107 = arith.divf %105, %106 : vector<8x32xf32>
    %108 = vector.extract_strided_slice %14 {offsets = [24, 0], sizes = [8, 32], strides = [1, 1]} : vector<64x32xf32> to vector<8x32xf32>
    %109 = arith.addf %93, %8 : vector<8x32xf32>
    %110 = arith.mulf %100, %109 : vector<8x32xf32>
    %111 = arith.addf %108, %110 : vector<8x32xf32>
    %112 = math.tanh %111 : vector<8x32xf32>
    %113 = arith.subf %90, %112 : vector<8x32xf32>
    %114 = arith.mulf %107, %113 : vector<8x32xf32>
    %115 = arith.addf %112, %114 : vector<8x32xf32>
    %cst_29 = arith.constant dense<0.000000e+00> : vector<8x32xf32>
    %116 = tpu.matmul %115, %2, %cst_29 {dimension_numbers = #tpu.dot_dimension_numbers<[1], [0], [0], [1], [0, 0, 1, 1], [], []>} : vector<8x32xf32>, vector<32x32xf32>, vector<8x32xf32> -> vector<8x32xf32>
    %cst_30 = arith.constant dense<0.000000e+00> : vector<8x32xf32>
    %117 = tpu.matmul %115, %3, %cst_30 {dimension_numbers = #tpu.dot_dimension_numbers<[1], [0], [0], [1], [0, 0, 1, 1], [], []>} : vector<8x32xf32>, vector<32x32xf32>, vector<8x32xf32> -> vector<8x32xf32>
    %cst_31 = arith.constant dense<0.000000e+00> : vector<8x32xf32>
    %118 = tpu.matmul %115, %4, %cst_31 {dimension_numbers = #tpu.dot_dimension_numbers<[1], [0], [0], [1], [0, 0, 1, 1], [], []>} : vector<8x32xf32>, vector<32x32xf32>, vector<8x32xf32> -> vector<8x32xf32>
    %119 = vector.extract_strided_slice %12 {offsets = [32, 0], sizes = [8, 32], strides = [1, 1]} : vector<64x32xf32> to vector<8x32xf32>
    %120 = arith.addf %119, %116 : vector<8x32xf32>
    %121 = arith.negf %120 : vector<8x32xf32>
    %122 = math.exp %121 : vector<8x32xf32>
    %cst_32 = arith.constant 1.000000e+00 : f32
    %123 = vector.broadcast %cst_32 : f32 to vector<8x32xf32>
    %124 = arith.addf %123, %122 : vector<8x32xf32>
    %125 = arith.divf %123, %124 : vector<8x32xf32>
    %126 = vector.extract_strided_slice %13 {offsets = [32, 0], sizes = [8, 32], strides = [1, 1]} : vector<64x32xf32> to vector<8x32xf32>
    %127 = arith.addf %126, %117 : vector<8x32xf32>
    %128 = arith.negf %127 : vector<8x32xf32>
    %129 = math.exp %128 : vector<8x32xf32>
    %cst_33 = arith.constant 1.000000e+00 : f32
    %130 = vector.broadcast %cst_33 : f32 to vector<8x32xf32>
    %131 = arith.addf %130, %129 : vector<8x32xf32>
    %132 = arith.divf %130, %131 : vector<8x32xf32>
    %133 = vector.extract_strided_slice %14 {offsets = [32, 0], sizes = [8, 32], strides = [1, 1]} : vector<64x32xf32> to vector<8x32xf32>
    %134 = arith.addf %118, %8 : vector<8x32xf32>
    %135 = arith.mulf %125, %134 : vector<8x32xf32>
    %136 = arith.addf %133, %135 : vector<8x32xf32>
    %137 = math.tanh %136 : vector<8x32xf32>
    %138 = arith.subf %115, %137 : vector<8x32xf32>
    %139 = arith.mulf %132, %138 : vector<8x32xf32>
    %140 = arith.addf %137, %139 : vector<8x32xf32>
    %cst_34 = arith.constant dense<0.000000e+00> : vector<8x32xf32>
    %141 = tpu.matmul %140, %2, %cst_34 {dimension_numbers = #tpu.dot_dimension_numbers<[1], [0], [0], [1], [0, 0, 1, 1], [], []>} : vector<8x32xf32>, vector<32x32xf32>, vector<8x32xf32> -> vector<8x32xf32>
    %cst_35 = arith.constant dense<0.000000e+00> : vector<8x32xf32>
    %142 = tpu.matmul %140, %3, %cst_35 {dimension_numbers = #tpu.dot_dimension_numbers<[1], [0], [0], [1], [0, 0, 1, 1], [], []>} : vector<8x32xf32>, vector<32x32xf32>, vector<8x32xf32> -> vector<8x32xf32>
    %cst_36 = arith.constant dense<0.000000e+00> : vector<8x32xf32>
    %143 = tpu.matmul %140, %4, %cst_36 {dimension_numbers = #tpu.dot_dimension_numbers<[1], [0], [0], [1], [0, 0, 1, 1], [], []>} : vector<8x32xf32>, vector<32x32xf32>, vector<8x32xf32> -> vector<8x32xf32>
    %144 = vector.extract_strided_slice %12 {offsets = [40, 0], sizes = [8, 32], strides = [1, 1]} : vector<64x32xf32> to vector<8x32xf32>
    %145 = arith.addf %144, %141 : vector<8x32xf32>
    %146 = arith.negf %145 : vector<8x32xf32>
    %147 = math.exp %146 : vector<8x32xf32>
    %cst_37 = arith.constant 1.000000e+00 : f32
    %148 = vector.broadcast %cst_37 : f32 to vector<8x32xf32>
    %149 = arith.addf %148, %147 : vector<8x32xf32>
    %150 = arith.divf %148, %149 : vector<8x32xf32>
    %151 = vector.extract_strided_slice %13 {offsets = [40, 0], sizes = [8, 32], strides = [1, 1]} : vector<64x32xf32> to vector<8x32xf32>
    %152 = arith.addf %151, %142 : vector<8x32xf32>
    %153 = arith.negf %152 : vector<8x32xf32>
    %154 = math.exp %153 : vector<8x32xf32>
    %cst_38 = arith.constant 1.000000e+00 : f32
    %155 = vector.broadcast %cst_38 : f32 to vector<8x32xf32>
    %156 = arith.addf %155, %154 : vector<8x32xf32>
    %157 = arith.divf %155, %156 : vector<8x32xf32>
    %158 = vector.extract_strided_slice %14 {offsets = [40, 0], sizes = [8, 32], strides = [1, 1]} : vector<64x32xf32> to vector<8x32xf32>
    %159 = arith.addf %143, %8 : vector<8x32xf32>
    %160 = arith.mulf %150, %159 : vector<8x32xf32>
    %161 = arith.addf %158, %160 : vector<8x32xf32>
    %162 = math.tanh %161 : vector<8x32xf32>
    %163 = arith.subf %140, %162 : vector<8x32xf32>
    %164 = arith.mulf %157, %163 : vector<8x32xf32>
    %165 = arith.addf %162, %164 : vector<8x32xf32>
    %cst_39 = arith.constant dense<0.000000e+00> : vector<8x32xf32>
    %166 = tpu.matmul %165, %2, %cst_39 {dimension_numbers = #tpu.dot_dimension_numbers<[1], [0], [0], [1], [0, 0, 1, 1], [], []>} : vector<8x32xf32>, vector<32x32xf32>, vector<8x32xf32> -> vector<8x32xf32>
    %cst_40 = arith.constant dense<0.000000e+00> : vector<8x32xf32>
    %167 = tpu.matmul %165, %3, %cst_40 {dimension_numbers = #tpu.dot_dimension_numbers<[1], [0], [0], [1], [0, 0, 1, 1], [], []>} : vector<8x32xf32>, vector<32x32xf32>, vector<8x32xf32> -> vector<8x32xf32>
    %cst_41 = arith.constant dense<0.000000e+00> : vector<8x32xf32>
    %168 = tpu.matmul %165, %4, %cst_41 {dimension_numbers = #tpu.dot_dimension_numbers<[1], [0], [0], [1], [0, 0, 1, 1], [], []>} : vector<8x32xf32>, vector<32x32xf32>, vector<8x32xf32> -> vector<8x32xf32>
    %169 = vector.extract_strided_slice %12 {offsets = [48, 0], sizes = [8, 32], strides = [1, 1]} : vector<64x32xf32> to vector<8x32xf32>
    %170 = arith.addf %169, %166 : vector<8x32xf32>
    %171 = arith.negf %170 : vector<8x32xf32>
    %172 = math.exp %171 : vector<8x32xf32>
    %cst_42 = arith.constant 1.000000e+00 : f32
    %173 = vector.broadcast %cst_42 : f32 to vector<8x32xf32>
    %174 = arith.addf %173, %172 : vector<8x32xf32>
    %175 = arith.divf %173, %174 : vector<8x32xf32>
    %176 = vector.extract_strided_slice %13 {offsets = [48, 0], sizes = [8, 32], strides = [1, 1]} : vector<64x32xf32> to vector<8x32xf32>
    %177 = arith.addf %176, %167 : vector<8x32xf32>
    %178 = arith.negf %177 : vector<8x32xf32>
    %179 = math.exp %178 : vector<8x32xf32>
    %cst_43 = arith.constant 1.000000e+00 : f32
    %180 = vector.broadcast %cst_43 : f32 to vector<8x32xf32>
    %181 = arith.addf %180, %179 : vector<8x32xf32>
    %182 = arith.divf %180, %181 : vector<8x32xf32>
    %183 = vector.extract_strided_slice %14 {offsets = [48, 0], sizes = [8, 32], strides = [1, 1]} : vector<64x32xf32> to vector<8x32xf32>
    %184 = arith.addf %168, %8 : vector<8x32xf32>
    %185 = arith.mulf %175, %184 : vector<8x32xf32>
    %186 = arith.addf %183, %185 : vector<8x32xf32>
    %187 = math.tanh %186 : vector<8x32xf32>
    %188 = arith.subf %165, %187 : vector<8x32xf32>
    %189 = arith.mulf %182, %188 : vector<8x32xf32>
    %190 = arith.addf %187, %189 : vector<8x32xf32>
    %cst_44 = arith.constant dense<0.000000e+00> : vector<8x32xf32>
    %191 = tpu.matmul %190, %2, %cst_44 {dimension_numbers = #tpu.dot_dimension_numbers<[1], [0], [0], [1], [0, 0, 1, 1], [], []>} : vector<8x32xf32>, vector<32x32xf32>, vector<8x32xf32> -> vector<8x32xf32>
    %cst_45 = arith.constant dense<0.000000e+00> : vector<8x32xf32>
    %192 = tpu.matmul %190, %3, %cst_45 {dimension_numbers = #tpu.dot_dimension_numbers<[1], [0], [0], [1], [0, 0, 1, 1], [], []>} : vector<8x32xf32>, vector<32x32xf32>, vector<8x32xf32> -> vector<8x32xf32>
    %cst_46 = arith.constant dense<0.000000e+00> : vector<8x32xf32>
    %193 = tpu.matmul %190, %4, %cst_46 {dimension_numbers = #tpu.dot_dimension_numbers<[1], [0], [0], [1], [0, 0, 1, 1], [], []>} : vector<8x32xf32>, vector<32x32xf32>, vector<8x32xf32> -> vector<8x32xf32>
    %194 = vector.extract_strided_slice %12 {offsets = [56, 0], sizes = [8, 32], strides = [1, 1]} : vector<64x32xf32> to vector<8x32xf32>
    %195 = arith.addf %194, %191 : vector<8x32xf32>
    %196 = arith.negf %195 : vector<8x32xf32>
    %197 = math.exp %196 : vector<8x32xf32>
    %cst_47 = arith.constant 1.000000e+00 : f32
    %198 = vector.broadcast %cst_47 : f32 to vector<8x32xf32>
    %199 = arith.addf %198, %197 : vector<8x32xf32>
    %200 = arith.divf %198, %199 : vector<8x32xf32>
    %201 = vector.extract_strided_slice %13 {offsets = [56, 0], sizes = [8, 32], strides = [1, 1]} : vector<64x32xf32> to vector<8x32xf32>
    %202 = arith.addf %201, %192 : vector<8x32xf32>
    %203 = arith.negf %202 : vector<8x32xf32>
    %204 = math.exp %203 : vector<8x32xf32>
    %cst_48 = arith.constant 1.000000e+00 : f32
    %205 = vector.broadcast %cst_48 : f32 to vector<8x32xf32>
    %206 = arith.addf %205, %204 : vector<8x32xf32>
    %207 = arith.divf %205, %206 : vector<8x32xf32>
    %208 = vector.extract_strided_slice %14 {offsets = [56, 0], sizes = [8, 32], strides = [1, 1]} : vector<64x32xf32> to vector<8x32xf32>
    %209 = arith.addf %193, %8 : vector<8x32xf32>
    %210 = arith.mulf %200, %209 : vector<8x32xf32>
    %211 = arith.addf %208, %210 : vector<8x32xf32>
    %212 = math.tanh %211 : vector<8x32xf32>
    %213 = arith.subf %190, %212 : vector<8x32xf32>
    %214 = arith.mulf %207, %213 : vector<8x32xf32>
    %215 = arith.addf %212, %214 : vector<8x32xf32>
    %216 = tpu.concatenate %40, %65, %90, %115, %140, %165, %190, %215 in 0 : vector<8x32xf32>, vector<8x32xf32>, vector<8x32xf32>, vector<8x32xf32>, vector<8x32xf32>, vector<8x32xf32>, vector<8x32xf32>, vector<8x32xf32> -> vector<64x32xf32>
    %c0_49 = arith.constant 0 : index
    %c0_50 = arith.constant 0 : index
    %217 = vector.load %arg2[%c0_49, %c0_50] : memref<136x96xf32, #tpu.memory_space<vmem>>, vector<32x96xf32>
    %c32 = arith.constant 32 : index
    %c0_51 = arith.constant 0 : index
    %218 = vector.load %arg2[%c32, %c0_51] : memref<136x96xf32, #tpu.memory_space<vmem>>, vector<32x32xf32>
    %c64 = arith.constant 64 : index
    %c0_52 = arith.constant 0 : index
    %219 = vector.load %arg2[%c64, %c0_52] : memref<136x96xf32, #tpu.memory_space<vmem>>, vector<32x32xf32>
    %c96 = arith.constant 96 : index
    %c0_53 = arith.constant 0 : index
    %220 = vector.load %arg2[%c96, %c0_53] : memref<136x96xf32, #tpu.memory_space<vmem>>, vector<32x32xf32>
    %c128 = arith.constant 128 : index
    %c0_54 = arith.constant 0 : index
    %221 = vector.load %arg2[%c128, %c0_54] : memref<136x96xf32, #tpu.memory_space<vmem>>, vector<1x96xf32>
    %c129 = arith.constant 129 : index
    %c0_55 = arith.constant 0 : index
    %222 = vector.load %arg2[%c129, %c0_55] : memref<136x96xf32, #tpu.memory_space<vmem>>, vector<1x32xf32>
    %223 = vector.shape_cast %222 : vector<1x32xf32> to vector<1x32xf32>
    %224 = vector.broadcast %223 : vector<1x32xf32> to vector<8x32xf32>
    %cst_56 = arith.constant dense<0.000000e+00> : vector<64x96xf32>
    %225 = tpu.matmul %216, %217, %cst_56 {dimension_numbers = #tpu.dot_dimension_numbers<[1], [0], [0], [1], [0, 0, 1, 1], [], []>} : vector<64x32xf32>, vector<32x96xf32>, vector<64x96xf32> -> vector<64x96xf32>
    %226 = vector.broadcast %221 : vector<1x96xf32> to vector<64x96xf32>
    %227 = arith.addf %225, %226 : vector<64x96xf32>
    %228 = vector.extract_strided_slice %227 {offsets = [0, 0], sizes = [64, 32], strides = [1, 1]} : vector<64x96xf32> to vector<64x32xf32>
    %229 = vector.extract_strided_slice %227 {offsets = [0, 32], sizes = [64, 32], strides = [1, 1]} : vector<64x96xf32> to vector<64x32xf32>
    %230 = vector.extract_strided_slice %227 {offsets = [0, 64], sizes = [64, 32], strides = [1, 1]} : vector<64x96xf32> to vector<64x32xf32>
    %cst_57 = arith.constant 0.000000e+00 : f32
    %231 = vector.broadcast %cst_57 : f32 to vector<8x32xf32>
    %cst_58 = arith.constant dense<0.000000e+00> : vector<8x32xf32>
    %232 = tpu.matmul %231, %218, %cst_58 {dimension_numbers = #tpu.dot_dimension_numbers<[1], [0], [0], [1], [0, 0, 1, 1], [], []>} : vector<8x32xf32>, vector<32x32xf32>, vector<8x32xf32> -> vector<8x32xf32>
    %cst_59 = arith.constant dense<0.000000e+00> : vector<8x32xf32>
    %233 = tpu.matmul %231, %219, %cst_59 {dimension_numbers = #tpu.dot_dimension_numbers<[1], [0], [0], [1], [0, 0, 1, 1], [], []>} : vector<8x32xf32>, vector<32x32xf32>, vector<8x32xf32> -> vector<8x32xf32>
    %cst_60 = arith.constant dense<0.000000e+00> : vector<8x32xf32>
    %234 = tpu.matmul %231, %220, %cst_60 {dimension_numbers = #tpu.dot_dimension_numbers<[1], [0], [0], [1], [0, 0, 1, 1], [], []>} : vector<8x32xf32>, vector<32x32xf32>, vector<8x32xf32> -> vector<8x32xf32>
    %235 = vector.extract_strided_slice %228 {offsets = [0, 0], sizes = [8, 32], strides = [1, 1]} : vector<64x32xf32> to vector<8x32xf32>
    %236 = arith.addf %235, %232 : vector<8x32xf32>
    %237 = arith.negf %236 : vector<8x32xf32>
    %238 = math.exp %237 : vector<8x32xf32>
    %cst_61 = arith.constant 1.000000e+00 : f32
    %239 = vector.broadcast %cst_61 : f32 to vector<8x32xf32>
    %240 = arith.addf %239, %238 : vector<8x32xf32>
    %241 = arith.divf %239, %240 : vector<8x32xf32>
    %242 = vector.extract_strided_slice %229 {offsets = [0, 0], sizes = [8, 32], strides = [1, 1]} : vector<64x32xf32> to vector<8x32xf32>
    %243 = arith.addf %242, %233 : vector<8x32xf32>
    %244 = arith.negf %243 : vector<8x32xf32>
    %245 = math.exp %244 : vector<8x32xf32>
    %cst_62 = arith.constant 1.000000e+00 : f32
    %246 = vector.broadcast %cst_62 : f32 to vector<8x32xf32>
    %247 = arith.addf %246, %245 : vector<8x32xf32>
    %248 = arith.divf %246, %247 : vector<8x32xf32>
    %249 = vector.extract_strided_slice %230 {offsets = [0, 0], sizes = [8, 32], strides = [1, 1]} : vector<64x32xf32> to vector<8x32xf32>
    %250 = arith.addf %234, %224 : vector<8x32xf32>
    %251 = arith.mulf %241, %250 : vector<8x32xf32>
    %252 = arith.addf %249, %251 : vector<8x32xf32>
    %253 = math.tanh %252 : vector<8x32xf32>
    %254 = arith.subf %231, %253 : vector<8x32xf32>
    %255 = arith.mulf %248, %254 : vector<8x32xf32>
    %256 = arith.addf %253, %255 : vector<8x32xf32>
    %cst_63 = arith.constant dense<0.000000e+00> : vector<8x32xf32>
    %257 = tpu.matmul %256, %218, %cst_63 {dimension_numbers = #tpu.dot_dimension_numbers<[1], [0], [0], [1], [0, 0, 1, 1], [], []>} : vector<8x32xf32>, vector<32x32xf32>, vector<8x32xf32> -> vector<8x32xf32>
    %cst_64 = arith.constant dense<0.000000e+00> : vector<8x32xf32>
    %258 = tpu.matmul %256, %219, %cst_64 {dimension_numbers = #tpu.dot_dimension_numbers<[1], [0], [0], [1], [0, 0, 1, 1], [], []>} : vector<8x32xf32>, vector<32x32xf32>, vector<8x32xf32> -> vector<8x32xf32>
    %cst_65 = arith.constant dense<0.000000e+00> : vector<8x32xf32>
    %259 = tpu.matmul %256, %220, %cst_65 {dimension_numbers = #tpu.dot_dimension_numbers<[1], [0], [0], [1], [0, 0, 1, 1], [], []>} : vector<8x32xf32>, vector<32x32xf32>, vector<8x32xf32> -> vector<8x32xf32>
    %260 = vector.extract_strided_slice %228 {offsets = [8, 0], sizes = [8, 32], strides = [1, 1]} : vector<64x32xf32> to vector<8x32xf32>
    %261 = arith.addf %260, %257 : vector<8x32xf32>
    %262 = arith.negf %261 : vector<8x32xf32>
    %263 = math.exp %262 : vector<8x32xf32>
    %cst_66 = arith.constant 1.000000e+00 : f32
    %264 = vector.broadcast %cst_66 : f32 to vector<8x32xf32>
    %265 = arith.addf %264, %263 : vector<8x32xf32>
    %266 = arith.divf %264, %265 : vector<8x32xf32>
    %267 = vector.extract_strided_slice %229 {offsets = [8, 0], sizes = [8, 32], strides = [1, 1]} : vector<64x32xf32> to vector<8x32xf32>
    %268 = arith.addf %267, %258 : vector<8x32xf32>
    %269 = arith.negf %268 : vector<8x32xf32>
    %270 = math.exp %269 : vector<8x32xf32>
    %cst_67 = arith.constant 1.000000e+00 : f32
    %271 = vector.broadcast %cst_67 : f32 to vector<8x32xf32>
    %272 = arith.addf %271, %270 : vector<8x32xf32>
    %273 = arith.divf %271, %272 : vector<8x32xf32>
    %274 = vector.extract_strided_slice %230 {offsets = [8, 0], sizes = [8, 32], strides = [1, 1]} : vector<64x32xf32> to vector<8x32xf32>
    %275 = arith.addf %259, %224 : vector<8x32xf32>
    %276 = arith.mulf %266, %275 : vector<8x32xf32>
    %277 = arith.addf %274, %276 : vector<8x32xf32>
    %278 = math.tanh %277 : vector<8x32xf32>
    %279 = arith.subf %256, %278 : vector<8x32xf32>
    %280 = arith.mulf %273, %279 : vector<8x32xf32>
    %281 = arith.addf %278, %280 : vector<8x32xf32>
    %cst_68 = arith.constant dense<0.000000e+00> : vector<8x32xf32>
    %282 = tpu.matmul %281, %218, %cst_68 {dimension_numbers = #tpu.dot_dimension_numbers<[1], [0], [0], [1], [0, 0, 1, 1], [], []>} : vector<8x32xf32>, vector<32x32xf32>, vector<8x32xf32> -> vector<8x32xf32>
    %cst_69 = arith.constant dense<0.000000e+00> : vector<8x32xf32>
    %283 = tpu.matmul %281, %219, %cst_69 {dimension_numbers = #tpu.dot_dimension_numbers<[1], [0], [0], [1], [0, 0, 1, 1], [], []>} : vector<8x32xf32>, vector<32x32xf32>, vector<8x32xf32> -> vector<8x32xf32>
    %cst_70 = arith.constant dense<0.000000e+00> : vector<8x32xf32>
    %284 = tpu.matmul %281, %220, %cst_70 {dimension_numbers = #tpu.dot_dimension_numbers<[1], [0], [0], [1], [0, 0, 1, 1], [], []>} : vector<8x32xf32>, vector<32x32xf32>, vector<8x32xf32> -> vector<8x32xf32>
    %285 = vector.extract_strided_slice %228 {offsets = [16, 0], sizes = [8, 32], strides = [1, 1]} : vector<64x32xf32> to vector<8x32xf32>
    %286 = arith.addf %285, %282 : vector<8x32xf32>
    %287 = arith.negf %286 : vector<8x32xf32>
    %288 = math.exp %287 : vector<8x32xf32>
    %cst_71 = arith.constant 1.000000e+00 : f32
    %289 = vector.broadcast %cst_71 : f32 to vector<8x32xf32>
    %290 = arith.addf %289, %288 : vector<8x32xf32>
    %291 = arith.divf %289, %290 : vector<8x32xf32>
    %292 = vector.extract_strided_slice %229 {offsets = [16, 0], sizes = [8, 32], strides = [1, 1]} : vector<64x32xf32> to vector<8x32xf32>
    %293 = arith.addf %292, %283 : vector<8x32xf32>
    %294 = arith.negf %293 : vector<8x32xf32>
    %295 = math.exp %294 : vector<8x32xf32>
    %cst_72 = arith.constant 1.000000e+00 : f32
    %296 = vector.broadcast %cst_72 : f32 to vector<8x32xf32>
    %297 = arith.addf %296, %295 : vector<8x32xf32>
    %298 = arith.divf %296, %297 : vector<8x32xf32>
    %299 = vector.extract_strided_slice %230 {offsets = [16, 0], sizes = [8, 32], strides = [1, 1]} : vector<64x32xf32> to vector<8x32xf32>
    %300 = arith.addf %284, %224 : vector<8x32xf32>
    %301 = arith.mulf %291, %300 : vector<8x32xf32>
    %302 = arith.addf %299, %301 : vector<8x32xf32>
    %303 = math.tanh %302 : vector<8x32xf32>
    %304 = arith.subf %281, %303 : vector<8x32xf32>
    %305 = arith.mulf %298, %304 : vector<8x32xf32>
    %306 = arith.addf %303, %305 : vector<8x32xf32>
    %cst_73 = arith.constant dense<0.000000e+00> : vector<8x32xf32>
    %307 = tpu.matmul %306, %218, %cst_73 {dimension_numbers = #tpu.dot_dimension_numbers<[1], [0], [0], [1], [0, 0, 1, 1], [], []>} : vector<8x32xf32>, vector<32x32xf32>, vector<8x32xf32> -> vector<8x32xf32>
    %cst_74 = arith.constant dense<0.000000e+00> : vector<8x32xf32>
    %308 = tpu.matmul %306, %219, %cst_74 {dimension_numbers = #tpu.dot_dimension_numbers<[1], [0], [0], [1], [0, 0, 1, 1], [], []>} : vector<8x32xf32>, vector<32x32xf32>, vector<8x32xf32> -> vector<8x32xf32>
    %cst_75 = arith.constant dense<0.000000e+00> : vector<8x32xf32>
    %309 = tpu.matmul %306, %220, %cst_75 {dimension_numbers = #tpu.dot_dimension_numbers<[1], [0], [0], [1], [0, 0, 1, 1], [], []>} : vector<8x32xf32>, vector<32x32xf32>, vector<8x32xf32> -> vector<8x32xf32>
    %310 = vector.extract_strided_slice %228 {offsets = [24, 0], sizes = [8, 32], strides = [1, 1]} : vector<64x32xf32> to vector<8x32xf32>
    %311 = arith.addf %310, %307 : vector<8x32xf32>
    %312 = arith.negf %311 : vector<8x32xf32>
    %313 = math.exp %312 : vector<8x32xf32>
    %cst_76 = arith.constant 1.000000e+00 : f32
    %314 = vector.broadcast %cst_76 : f32 to vector<8x32xf32>
    %315 = arith.addf %314, %313 : vector<8x32xf32>
    %316 = arith.divf %314, %315 : vector<8x32xf32>
    %317 = vector.extract_strided_slice %229 {offsets = [24, 0], sizes = [8, 32], strides = [1, 1]} : vector<64x32xf32> to vector<8x32xf32>
    %318 = arith.addf %317, %308 : vector<8x32xf32>
    %319 = arith.negf %318 : vector<8x32xf32>
    %320 = math.exp %319 : vector<8x32xf32>
    %cst_77 = arith.constant 1.000000e+00 : f32
    %321 = vector.broadcast %cst_77 : f32 to vector<8x32xf32>
    %322 = arith.addf %321, %320 : vector<8x32xf32>
    %323 = arith.divf %321, %322 : vector<8x32xf32>
    %324 = vector.extract_strided_slice %230 {offsets = [24, 0], sizes = [8, 32], strides = [1, 1]} : vector<64x32xf32> to vector<8x32xf32>
    %325 = arith.addf %309, %224 : vector<8x32xf32>
    %326 = arith.mulf %316, %325 : vector<8x32xf32>
    %327 = arith.addf %324, %326 : vector<8x32xf32>
    %328 = math.tanh %327 : vector<8x32xf32>
    %329 = arith.subf %306, %328 : vector<8x32xf32>
    %330 = arith.mulf %323, %329 : vector<8x32xf32>
    %331 = arith.addf %328, %330 : vector<8x32xf32>
    %cst_78 = arith.constant dense<0.000000e+00> : vector<8x32xf32>
    %332 = tpu.matmul %331, %218, %cst_78 {dimension_numbers = #tpu.dot_dimension_numbers<[1], [0], [0], [1], [0, 0, 1, 1], [], []>} : vector<8x32xf32>, vector<32x32xf32>, vector<8x32xf32> -> vector<8x32xf32>
    %cst_79 = arith.constant dense<0.000000e+00> : vector<8x32xf32>
    %333 = tpu.matmul %331, %219, %cst_79 {dimension_numbers = #tpu.dot_dimension_numbers<[1], [0], [0], [1], [0, 0, 1, 1], [], []>} : vector<8x32xf32>, vector<32x32xf32>, vector<8x32xf32> -> vector<8x32xf32>
    %cst_80 = arith.constant dense<0.000000e+00> : vector<8x32xf32>
    %334 = tpu.matmul %331, %220, %cst_80 {dimension_numbers = #tpu.dot_dimension_numbers<[1], [0], [0], [1], [0, 0, 1, 1], [], []>} : vector<8x32xf32>, vector<32x32xf32>, vector<8x32xf32> -> vector<8x32xf32>
    %335 = vector.extract_strided_slice %228 {offsets = [32, 0], sizes = [8, 32], strides = [1, 1]} : vector<64x32xf32> to vector<8x32xf32>
    %336 = arith.addf %335, %332 : vector<8x32xf32>
    %337 = arith.negf %336 : vector<8x32xf32>
    %338 = math.exp %337 : vector<8x32xf32>
    %cst_81 = arith.constant 1.000000e+00 : f32
    %339 = vector.broadcast %cst_81 : f32 to vector<8x32xf32>
    %340 = arith.addf %339, %338 : vector<8x32xf32>
    %341 = arith.divf %339, %340 : vector<8x32xf32>
    %342 = vector.extract_strided_slice %229 {offsets = [32, 0], sizes = [8, 32], strides = [1, 1]} : vector<64x32xf32> to vector<8x32xf32>
    %343 = arith.addf %342, %333 : vector<8x32xf32>
    %344 = arith.negf %343 : vector<8x32xf32>
    %345 = math.exp %344 : vector<8x32xf32>
    %cst_82 = arith.constant 1.000000e+00 : f32
    %346 = vector.broadcast %cst_82 : f32 to vector<8x32xf32>
    %347 = arith.addf %346, %345 : vector<8x32xf32>
    %348 = arith.divf %346, %347 : vector<8x32xf32>
    %349 = vector.extract_strided_slice %230 {offsets = [32, 0], sizes = [8, 32], strides = [1, 1]} : vector<64x32xf32> to vector<8x32xf32>
    %350 = arith.addf %334, %224 : vector<8x32xf32>
    %351 = arith.mulf %341, %350 : vector<8x32xf32>
    %352 = arith.addf %349, %351 : vector<8x32xf32>
    %353 = math.tanh %352 : vector<8x32xf32>
    %354 = arith.subf %331, %353 : vector<8x32xf32>
    %355 = arith.mulf %348, %354 : vector<8x32xf32>
    %356 = arith.addf %353, %355 : vector<8x32xf32>
    %cst_83 = arith.constant dense<0.000000e+00> : vector<8x32xf32>
    %357 = tpu.matmul %356, %218, %cst_83 {dimension_numbers = #tpu.dot_dimension_numbers<[1], [0], [0], [1], [0, 0, 1, 1], [], []>} : vector<8x32xf32>, vector<32x32xf32>, vector<8x32xf32> -> vector<8x32xf32>
    %cst_84 = arith.constant dense<0.000000e+00> : vector<8x32xf32>
    %358 = tpu.matmul %356, %219, %cst_84 {dimension_numbers = #tpu.dot_dimension_numbers<[1], [0], [0], [1], [0, 0, 1, 1], [], []>} : vector<8x32xf32>, vector<32x32xf32>, vector<8x32xf32> -> vector<8x32xf32>
    %cst_85 = arith.constant dense<0.000000e+00> : vector<8x32xf32>
    %359 = tpu.matmul %356, %220, %cst_85 {dimension_numbers = #tpu.dot_dimension_numbers<[1], [0], [0], [1], [0, 0, 1, 1], [], []>} : vector<8x32xf32>, vector<32x32xf32>, vector<8x32xf32> -> vector<8x32xf32>
    %360 = vector.extract_strided_slice %228 {offsets = [40, 0], sizes = [8, 32], strides = [1, 1]} : vector<64x32xf32> to vector<8x32xf32>
    %361 = arith.addf %360, %357 : vector<8x32xf32>
    %362 = arith.negf %361 : vector<8x32xf32>
    %363 = math.exp %362 : vector<8x32xf32>
    %cst_86 = arith.constant 1.000000e+00 : f32
    %364 = vector.broadcast %cst_86 : f32 to vector<8x32xf32>
    %365 = arith.addf %364, %363 : vector<8x32xf32>
    %366 = arith.divf %364, %365 : vector<8x32xf32>
    %367 = vector.extract_strided_slice %229 {offsets = [40, 0], sizes = [8, 32], strides = [1, 1]} : vector<64x32xf32> to vector<8x32xf32>
    %368 = arith.addf %367, %358 : vector<8x32xf32>
    %369 = arith.negf %368 : vector<8x32xf32>
    %370 = math.exp %369 : vector<8x32xf32>
    %cst_87 = arith.constant 1.000000e+00 : f32
    %371 = vector.broadcast %cst_87 : f32 to vector<8x32xf32>
    %372 = arith.addf %371, %370 : vector<8x32xf32>
    %373 = arith.divf %371, %372 : vector<8x32xf32>
    %374 = vector.extract_strided_slice %230 {offsets = [40, 0], sizes = [8, 32], strides = [1, 1]} : vector<64x32xf32> to vector<8x32xf32>
    %375 = arith.addf %359, %224 : vector<8x32xf32>
    %376 = arith.mulf %366, %375 : vector<8x32xf32>
    %377 = arith.addf %374, %376 : vector<8x32xf32>
    %378 = math.tanh %377 : vector<8x32xf32>
    %379 = arith.subf %356, %378 : vector<8x32xf32>
    %380 = arith.mulf %373, %379 : vector<8x32xf32>
    %381 = arith.addf %378, %380 : vector<8x32xf32>
    %cst_88 = arith.constant dense<0.000000e+00> : vector<8x32xf32>
    %382 = tpu.matmul %381, %218, %cst_88 {dimension_numbers = #tpu.dot_dimension_numbers<[1], [0], [0], [1], [0, 0, 1, 1], [], []>} : vector<8x32xf32>, vector<32x32xf32>, vector<8x32xf32> -> vector<8x32xf32>
    %cst_89 = arith.constant dense<0.000000e+00> : vector<8x32xf32>
    %383 = tpu.matmul %381, %219, %cst_89 {dimension_numbers = #tpu.dot_dimension_numbers<[1], [0], [0], [1], [0, 0, 1, 1], [], []>} : vector<8x32xf32>, vector<32x32xf32>, vector<8x32xf32> -> vector<8x32xf32>
    %cst_90 = arith.constant dense<0.000000e+00> : vector<8x32xf32>
    %384 = tpu.matmul %381, %220, %cst_90 {dimension_numbers = #tpu.dot_dimension_numbers<[1], [0], [0], [1], [0, 0, 1, 1], [], []>} : vector<8x32xf32>, vector<32x32xf32>, vector<8x32xf32> -> vector<8x32xf32>
    %385 = vector.extract_strided_slice %228 {offsets = [48, 0], sizes = [8, 32], strides = [1, 1]} : vector<64x32xf32> to vector<8x32xf32>
    %386 = arith.addf %385, %382 : vector<8x32xf32>
    %387 = arith.negf %386 : vector<8x32xf32>
    %388 = math.exp %387 : vector<8x32xf32>
    %cst_91 = arith.constant 1.000000e+00 : f32
    %389 = vector.broadcast %cst_91 : f32 to vector<8x32xf32>
    %390 = arith.addf %389, %388 : vector<8x32xf32>
    %391 = arith.divf %389, %390 : vector<8x32xf32>
    %392 = vector.extract_strided_slice %229 {offsets = [48, 0], sizes = [8, 32], strides = [1, 1]} : vector<64x32xf32> to vector<8x32xf32>
    %393 = arith.addf %392, %383 : vector<8x32xf32>
    %394 = arith.negf %393 : vector<8x32xf32>
    %395 = math.exp %394 : vector<8x32xf32>
    %cst_92 = arith.constant 1.000000e+00 : f32
    %396 = vector.broadcast %cst_92 : f32 to vector<8x32xf32>
    %397 = arith.addf %396, %395 : vector<8x32xf32>
    %398 = arith.divf %396, %397 : vector<8x32xf32>
    %399 = vector.extract_strided_slice %230 {offsets = [48, 0], sizes = [8, 32], strides = [1, 1]} : vector<64x32xf32> to vector<8x32xf32>
    %400 = arith.addf %384, %224 : vector<8x32xf32>
    %401 = arith.mulf %391, %400 : vector<8x32xf32>
    %402 = arith.addf %399, %401 : vector<8x32xf32>
    %403 = math.tanh %402 : vector<8x32xf32>
    %404 = arith.subf %381, %403 : vector<8x32xf32>
    %405 = arith.mulf %398, %404 : vector<8x32xf32>
    %406 = arith.addf %403, %405 : vector<8x32xf32>
    %cst_93 = arith.constant dense<0.000000e+00> : vector<8x32xf32>
    %407 = tpu.matmul %406, %218, %cst_93 {dimension_numbers = #tpu.dot_dimension_numbers<[1], [0], [0], [1], [0, 0, 1, 1], [], []>} : vector<8x32xf32>, vector<32x32xf32>, vector<8x32xf32> -> vector<8x32xf32>
    %cst_94 = arith.constant dense<0.000000e+00> : vector<8x32xf32>
    %408 = tpu.matmul %406, %219, %cst_94 {dimension_numbers = #tpu.dot_dimension_numbers<[1], [0], [0], [1], [0, 0, 1, 1], [], []>} : vector<8x32xf32>, vector<32x32xf32>, vector<8x32xf32> -> vector<8x32xf32>
    %cst_95 = arith.constant dense<0.000000e+00> : vector<8x32xf32>
    %409 = tpu.matmul %406, %220, %cst_95 {dimension_numbers = #tpu.dot_dimension_numbers<[1], [0], [0], [1], [0, 0, 1, 1], [], []>} : vector<8x32xf32>, vector<32x32xf32>, vector<8x32xf32> -> vector<8x32xf32>
    %410 = vector.extract_strided_slice %228 {offsets = [56, 0], sizes = [8, 32], strides = [1, 1]} : vector<64x32xf32> to vector<8x32xf32>
    %411 = arith.addf %410, %407 : vector<8x32xf32>
    %412 = arith.negf %411 : vector<8x32xf32>
    %413 = math.exp %412 : vector<8x32xf32>
    %cst_96 = arith.constant 1.000000e+00 : f32
    %414 = vector.broadcast %cst_96 : f32 to vector<8x32xf32>
    %415 = arith.addf %414, %413 : vector<8x32xf32>
    %416 = arith.divf %414, %415 : vector<8x32xf32>
    %417 = vector.extract_strided_slice %229 {offsets = [56, 0], sizes = [8, 32], strides = [1, 1]} : vector<64x32xf32> to vector<8x32xf32>
    %418 = arith.addf %417, %408 : vector<8x32xf32>
    %419 = arith.negf %418 : vector<8x32xf32>
    %420 = math.exp %419 : vector<8x32xf32>
    %cst_97 = arith.constant 1.000000e+00 : f32
    %421 = vector.broadcast %cst_97 : f32 to vector<8x32xf32>
    %422 = arith.addf %421, %420 : vector<8x32xf32>
    %423 = arith.divf %421, %422 : vector<8x32xf32>
    %424 = vector.extract_strided_slice %230 {offsets = [56, 0], sizes = [8, 32], strides = [1, 1]} : vector<64x32xf32> to vector<8x32xf32>
    %425 = arith.addf %409, %224 : vector<8x32xf32>
    %426 = arith.mulf %416, %425 : vector<8x32xf32>
    %427 = arith.addf %424, %426 : vector<8x32xf32>
    %428 = math.tanh %427 : vector<8x32xf32>
    %429 = arith.subf %406, %428 : vector<8x32xf32>
    %430 = arith.mulf %423, %429 : vector<8x32xf32>
    %431 = arith.addf %428, %430 : vector<8x32xf32>
    %432 = vector.extract_strided_slice %431 {offsets = [0, 0], sizes = [2, 32], strides = [1, 1]} : vector<8x32xf32> to vector<2x32xf32>
    %c0_98 = arith.constant 0 : index
    %c0_99 = arith.constant 0 : index
    %433 = vector.load %arg3[%c0_98, %c0_99] : memref<2x32xf32, #tpu.memory_space<vmem>>, vector<2x32xf32>
    tpu.vector_store %arg3[%c0_98, %c0_99], %432 {strides = array<i32>} : memref<2x32xf32, #tpu.memory_space<vmem>>, vector<2x32xf32>,
    return
  }
}

</mosaic_0001>

<bundles_post_ra>
// kernel: _state_encoder_forward_impl.1
= control target key start
LH: loop header
LB: loop body
LE: loop exit
PB: predicated region body
PF: predicated region fallthrough
CT: control target
= control target key end

     0   :  { %vm46_vm0 = vcmask 64512   ;;  %v5451_v3 = vmov 0.0   ;;  %vm5452_vm1 = vmmov 0   ;;  %s6412_s0 = inlined_call_operand.vmem [shape: f32[64,8], index: 0, kind: input, shape index: {}]   ;;  %s6413_s1 = inlined_call_operand.vmem [shape: f32[112,96], index: 1, kind: input, shape index: {}]   ;;  %s6414_s2 = inlined_call_operand.vmem [shape: f32[136,96], index: 2, kind: input, shape index: {}]   ;;  %s6415_s3 = inlined_call_operand.hbm [shape: f32[2,32], index: 3, kind: output, shape index: {}]  }
   0x1   :  { %v23_v0 = vld [vmem:[%s6413_s1] sm:$0xff]  ;;  %4711 = vmatprep.subr.mxu1 %v5451_v3  ;;  %v16_v4 = vld [vmem:[%s6412_s0 + $0x8] sm:$0xff]  ;;  %v5496_v5 = vld [vmem:[%s6413_s1 + $0x18] sm:$0xff]  ;;  %4719 = vmatprep.mubr.msk.f32.mxu1 %vm5452_vm1, %v5451_v3 }
   0x2   :  { %v15_v1 = vld [vmem:[%s6412_s0] sm:$0xff]  ;;  %4697 = vmatprep.subr.mxu0 %v23_v0  ;;  %v5509_v7 = vld [vmem:[%s6413_s1 + $0x10] sm:$0xff]  ;;  %v18_v9 = vld [vmem:[%s6412_s0 + $0x18] sm:$0xff] }
   0x3   :  { %v5486_v2 = vld [vmem:[%s6413_s1 + $0x20] sm:$0xff]  ;;  %4698 = vmatpush3.msra.mxu0 %v23_v0  ;;  %4699 = vmatprep.mubr.msk.f32.mxu0 %vm46_vm0, %v15_v1  ;;  %v17_v8 = vld [vmem:[%s6412_s0 + $0x10] sm:$0xff]  ;;  %v5525_v10 = vld [vmem:[%s6413_s1 + $0x8] sm:$0xff] }
   0x4   :  { %4712 = vmatpush3.msra.mxu1 %v5486_v2  ;;  %4700 = vmatmul.mubr.msk.f32.vlgmr.msra.gmra.mxu0 %vm46_vm0, %v16_v4  ;;  %v5503_v6 = vld [vmem:[%s6413_s1 + $0x60] sm:$0xff]  ;;  %v5533_v11 = vld [vmem:[%s6413_s1 + $0x58] sm:$0xff] }
   0x5   :  { %4713 = vmatprep.subr.mxu1 %v5451_v3  ;;  %4733 = vmatprep.subr.mxu0 %v5451_v3 }
   0x6   :  { %4714 = vmatpush3.msra.mxu1 %v5496_v5  ;;  %4734 = vmatpush3.msra.mxu0 %v5503_v6 }
   0x7   :  { %4715 = vmatprep.subr.mxu1 %v5451_v3  ;;  %4702 = vmatprep.mubr.msk.f32.mxu0 %vm46_vm0, %v17_v8 }
   0x8   :  { %4716 = vmatpush3.msra.mxu1 %v5509_v7 }
   0x9   :  { %8 = vsyncpa [#allocation3], 0  ;;  %4717 = vmatprep.subr.mxu1 %v5451_v3  ;;  %4703 = vmatmul.mubr.msk.f32.gmra.mxu0 %vm46_vm0, %v18_v9  ;;  %v19_v12 = vld [vmem:[%s6412_s0 + $0x20] sm:$0xff]  ;;  %v20_v13 = vld [vmem:[%s6412_s0 + $0x28] sm:$0xff]  ;;  %s5453_s30 = smov 64   ;;  %s5454_s4 = smov 32  }
   0xa   :  { %4718 = vmatpush3.msra.mxu1 %v5525_v10  ;;  %4735 = vmatprep.subr.mxu0 %v5451_v3  ;;  %v5550_v14 = vld [vmem:[%s6413_s1 + $0x50] sm:$0xff]  ;;  %v5560_v16 = vld [vmem:[%s6413_s1 + $0x40] sm:$0xff]  ;;  %v5566_v17 = vld [vmem:[%s6413_s1 + $0x48] sm:$0xff]  ;;  %s5455_s5 = smov 96   ;;  %vm176_vm2 = vcmask 261120   ;;  %vm4326_vm3 = vcmask 254976  }
   0xb   :  { %4720 = vmatmul.mubr.f32.vlgmr.msra.gmra.mxu1 %v5451_v3  ;;  %4736 = vmatpush3.msra.mxu0 %v5533_v11  ;;  %v21_v15 = vld [vmem:[%s6412_s0 + $0x30] sm:$0xff]  ;;  %v22_v18 = vld [vmem:[%s6412_s0 + $0x38] sm:$0xff]  ;;  %v5596_v21 = vld [vmem:[%s6413_s1 + $0x28] sm:$0xff] }
   0xc   :  { %4705 = vmatprep.mubr.msk.f32.mxu0 %vm46_vm0, %v19_v12  ;;  %4737 = vmatprep.subr.mxu0 %v5451_v3  ;;  %v5577_v19 = vld [vmem:[%s6413_s1 + $0x38] sm:$0xff]  ;;  %v5586_v20 = vld [vmem:[%s6413_s1 + $0x30] sm:$0xff]  ;;  %v4343_v22 = vld [vmem:[%s6413_s1 + $0x68] ss:$0 sm:$0xff] }
   0xd   :  { %4706 = vmatmul.mubr.msk.f32.gmra.mxu0 %vm46_vm0, %v20_v13  ;;  %4722 = vmatprep.subr.mxu1 %v5451_v3  ;;  %v5647_v49 = vld [vmem:[%s6413_s1 + $0x69] ss:$0 sm:$0xff] }
   0xe   :  { %4738 = vmatpush3.msra.mxu0 %v5550_v14  ;;  %4708 = vmatprep.mubr.msk.f32.mxu0 %vm46_vm0, %v21_v15 }
   0xf   :  { %4739 = vmatprep.subr.mxu0 %v5451_v3  ;;  %4723 = vmatpush3.msra.mxu1 %v5560_v16 }
  0x10   :  { %4740 = vmatpush3.msra.mxu0 %v5566_v17  ;;  %4724 = vmatprep.subr.mxu1 %v5451_v3 }
  0x11   :  { %4709 = vmatmul.mubr.msk.f32.gmra.mxu0 %vm46_vm0, %v22_v18  ;;  %4725 = vmatpush3.msra.mxu1 %v5577_v19 }
  0x12   :  { %4741 = vmatprep.mubr.msk.f32.mxu0 %vm5452_vm1, %v5451_v3  ;;  %4726 = vmatprep.subr.mxu1 %v5451_v3 }
  0x13   :  { %4727 = vmatpush3.msra.mxu1 %v5586_v20  ;;  %4730 = vmatprep.mubr.msk.f32.mxu1 %vm5452_vm1, %v5451_v3 }
  0x14   :  { %4728 = vmatprep.subr.mxu1 %v5451_v3  ;;  %4755 = vmatprep.subr.mxu0 %v5451_v3 }
  0x15   :  { %4742 = vmatmul.mubr.f32.vlgmr.msra.gmra.mxu0 %v5451_v3  ;;  %4729 = vmatpush3.msra.mxu1 %v5596_v21 }
  0x16   :  { %4731 = vmatmul.mubr.f32.vlgmr.msra.gmra.mxu1 %v5451_v3  ;;  %4744 = vmatprep.subr.mxu1 %v5451_v3 }
  0x17   :  { %4745 = vmatpush3.msra.mxu1 %v5486_v2  ;;  %4756 = vmatpush3.msra.mxu0 %v5560_v16 }
  0x18   :  { %4746 = vmatprep.subr.mxu1 %v5451_v3  ;;  %4757 = vmatprep.subr.mxu0 %v5451_v3 }
  0x19   :  { %4747 = vmatpush3.msra.mxu1 %v5496_v5  ;;  %4758 = vmatpush3.msra.mxu0 %v5577_v19 }
  0x1a   :  { %4748 = vmatprep.subr.mxu1 %v5451_v3  ;;  %4759 = vmatprep.subr.mxu0 %v5451_v3 }
  0x1b   :  { %4749 = vmatpush3.msra.mxu1 %v5509_v7  ;;  %4760 = vmatpush3.msra.mxu0 %v5586_v20 }
  0x1c   :  { %4750 = vmatprep.subr.mxu1 %v5451_v3  ;;  %4761 = vmatprep.subr.mxu0 %v5451_v3 }
  0x1d   :  { %4751 = vmatpush3.msra.mxu1 %v5525_v10  ;;  %4752 = vmatprep.mubr.msk.f32.mxu1 %vm5452_vm1, %v5451_v3 }
  0x1e   :  { %4762 = vmatpush3.msra.mxu0 %v5596_v21  ;;  %4763 = vmatprep.mubr.msk.f32.mxu0 %vm5452_vm1, %v5451_v3 }
  0x1f   :  { %4766 = vmatprep.subr.mxu1 %v5451_v3  ;;  %4777 = vmatprep.subr.mxu0 %v5451_v3 }
  0xc4   :  { %v4701_v23 = vpop.f32.mrf.mxu0 }
  0xc5   :  { %v5630_v24 = vadd.f32 %v4701_v23, %v4343_v22 }
  0xc6   :  { %v137_v25 = vpop.f32.mrf.mxu0 }
  0xc7   :  { %v138_v27 = vadd.f32 %v4343_v22, %v137_v25 }
  0xc9   :  { %v4704_v26 = vpop.f32.mrf.mxu0 }
  0xca   :  { %v5632_v28 = vadd.f32 %v4704_v26, %v4343_v22 }
  0xcb   :  { %v246_v29 = vpop.f32.mrf.mxu1  ;;  %v147_v30 = vpop.f32.mrf.mxu0 }
  0xcc   :  { %v320_v31 = vadd.f32 %v246_v29, %v138_v27  ;;  %v5634_v32 = vadd.f32 %v4343_v22, %v147_v30 }
  0xcd   :  { %v4721_v33 = vpop.f32.mrf.mxu1  ;;  %v4707_v34 = vpop.f32.mrf.mxu0 }
  0xce   :  { %v4352_v35 = vmul.f32 -1.442695, %v320_v31  ;;  %v5636_v36 = vadd.f32 %v4707_v34, %v4343_v22 }
  0xcf   :  { %v157_v37 = vpop.f32.mrf.mxu0 }
  0xd0   :  { %5265 = vpow2.f32 %v4352_v35  ;;  %v5638_v38 = vadd.f32 %v4343_v22, %v157_v37 }
  0xd1   :  { %v4710_v39 = vpop.f32.mrf.mxu0 }
  0xd2   :  { %v5640_v40 = vadd.f32 %v4710_v39, %v4343_v22 }
  0xd3   :  { %v167_v41 = vpop.f32.mrf.mxu0 }
  0xd4   :  { %v5642_v42 = vadd.f32 %v4343_v22, %v167_v41 }
  0xd5   :  { %v404_v43 = vpop.f32.mrf.mxu0 }
  0xd6   :  { %v316_v44 = vpop.f32.mrf.mxu1  ;;  %v405_v50 = vadd.f32 %v5647_v49, %v404_v43 }
  0xd7   :  { %v4743_v45 = vpop.f32.mrf.mxu0 }
  0xd8   :  { %v4732_v46 = vpop.f32.mrf.mxu1 }
  0xdd   :  { %v5266_v47 = vpop.eup %5265 }
  0xde   :  { %v324_v48 = vadd.f32 1.0, %v5266_v47 }
  0xe0   :  { %5267 = vrcp.f32 %v324_v48 }
  0xed   :  { %v5268_v51 = vpop.eup %5267 }
  0xee   :  { %v408_v52 = vmul.f32 %v5268_v51, %v405_v50 }
  0xf0   :  { %410 = vrot.lane.b32.xlu0 %v408_v52, %s5453_s30 }
  0xf4   :  { %328 = vrot.lane.b32.xlu0 %v316_v44, %s5454_s4 }
 0x162   :  { %v411_v53 = vpop.permute.xlu0 %410 }
 0x163   :  { %v413_v54 = vadd.f32 %v411_v53, %v138_v27 }
 0x165   :  { %5269 = vtanh.f32 %v413_v54 }
 0x166   :  { %v329_v57 = vpop.permute.xlu0 %328 }
 0x167   :  { %v331_v58 = vadd.f32 %v329_v57, %v138_v27 }
 0x169   :  { %v4353_v59 = vmul.f32 -1.442695, %v331_v58 }
 0x16b   :  { %5271 = vpow2.f32 %v4353_v59 }
 0x172   :  { %v5270_v55 = vpop.eup %5269 }
 0x173   :  { %v415_v56 = vsub.f32 0.0, %v5270_v55 }
 0x175   :  { %417 = vrot.lane.b32.xlu1 %v415_v56, %s5455_s5 }
 0x178   :  { %v5272_v60 = vpop.eup %5271 }
 0x179   :  { %v335_v61 = vadd.f32 1.0, %v5272_v60 }
 0x17b   :  { %5273 = vrcp.f32 %v335_v61 }
 0x188   :  { %v5274_v62 = vpop.eup %5273 }
 0x1e7   :  { %v418_v63 = vpop.permute.xlu1 %417 }
 0x1e8   :  { %v420_v0 = vmul.f32 %v5274_v62, %v418_v63 }
 0x1ea   :  { %422 = vrot.lane.b32.xlu1 %v420_v0, %s5454_s4 }
 0x25c   :  { %v423_v1 = vpop.permute.xlu1 %422 }
 0x25d   :  { %v425_v4 = vadd.f32 %v5270_v55, %v423_v1 }
 0x25f   :  { %427 = vrot.lane.b32.xlu0 %v425_v4, %s5453_s30 }
 0x2d1   :  { %v5655_v8 = vpop.permute.xlu0 %427 }
 0x2d2   :  { %4753 = vmatmul.mubr.msk.f32.vlgmr.msra.gmra.mxu1 %vm176_vm2, %v5655_v8  ;;  %4764 = vmatmul.mubr.msk.f32.vlgmr.msra.gmra.mxu0 %vm176_vm2, %v5655_v8 }
 0x2d3   :  { %4767 = vmatpush3.msra.mxu1 %v5503_v6  ;;  %4774 = vmatprep.mubr.msk.f32.mxu1 %vm5452_vm1, %v5451_v3 }
 0x2d4   :  { %4768 = vmatprep.subr.mxu1 %v5451_v3  ;;  %4778 = vmatpush3.msra.mxu0 %v5486_v2 }
 0x2d5   :  { %4769 = vmatpush3.msra.mxu1 %v5533_v11  ;;  %4779 = vmatprep.subr.mxu0 %v5451_v3 }
 0x2d6   :  { %4770 = vmatprep.subr.mxu1 %v5451_v3  ;;  %4780 = vmatpush3.msra.mxu0 %v5496_v5 }
 0x2d7   :  { %4771 = vmatpush3.msra.mxu1 %v5550_v14  ;;  %4781 = vmatprep.subr.mxu0 %v5451_v3 }
 0x2d8   :  { %4772 = vmatprep.subr.mxu1 %v5451_v3  ;;  %4782 = vmatpush3.msra.mxu0 %v5509_v7 }
 0x2d9   :  { %4773 = vmatpush3.msra.mxu1 %v5566_v17  ;;  %4783 = vmatprep.subr.mxu0 %v5451_v3 }
 0x2da   :  { %4775 = vmatmul.mubr.msk.f32.vlgmr.msra.gmra.mxu1 %vm176_vm2, %v5655_v8  ;;  %4788 = vmatprep.subr.mxu1 %v5451_v3 }
 0x2db   :  { %4789 = vmatpush3.msra.mxu1 %v5560_v16  ;;  %4784 = vmatpush3.msra.mxu0 %v5525_v10 }
 0x2dc   :  { %4790 = vmatprep.subr.mxu1 %v5451_v3  ;;  %4785 = vmatprep.mubr.msk.f32.mxu0 %vm5452_vm1, %v5451_v3 }
 0x2dd   :  { %4791 = vmatpush3.msra.mxu1 %v5577_v19  ;;  %4796 = vmatprep.mubr.msk.f32.mxu1 %vm5452_vm1, %v5451_v3 }
 0x2de   :  { %4792 = vmatprep.subr.mxu1 %v5451_v3  ;;  %4799 = vmatprep.subr.mxu0 %v5451_v3 }
 0x2df   :  { %4793 = vmatpush3.msra.mxu1 %v5586_v20 }
 0x2e0   :  { %4794 = vmatprep.subr.mxu1 %v5451_v3 }
 0x2e1   :  { %4795 = vmatpush3.msra.mxu1 %v5596_v21 }
 0x2e2   :  { %4810 = vmatprep.subr.mxu1 %v5451_v3 }
 0x392   :  { %v497_v9 = vpop.f32.mrf.mxu1  ;;  %v567_v12 = vpop.f32.mrf.mxu0 }
 0x393   :  { %v571_v13 = vadd.f32 %v497_v9, %v5630_v24  ;;  %579 = vrot.lane.b32.xlu0 %v567_v12, %s5454_s4 }
 0x394   :  { %v4754_v15 = vpop.f32.mrf.mxu1  ;;  %v4765_v18 = vpop.f32.mrf.mxu0 }
 0x395   :  { %v4356_v22 = vmul.f32 -1.442695, %v571_v13 }
 0x397   :  { %5275 = vpow2.f32 %v4356_v22 }
 0x39a   :  { %v655_v23 = vpop.f32.mrf.mxu1 }
 0x39b   :  { %v656_v29 = vadd.f32 %v5647_v49, %v655_v23 }
 0x39c   :  { %v4776_v25 = vpop.f32.mrf.mxu1 }
 0x3a4   :  { %v5276_v26 = vpop.eup %5275 }
 0x3a5   :  { %v575_v27 = vadd.f32 1.0, %v5276_v26 }
 0x3a7   :  { %5277 = vrcp.f32 %v575_v27 }
 0x3b4   :  { %v5278_v30 = vpop.eup %5277 }
 0x3b5   :  { %v659_v31 = vmul.f32 %v5278_v30, %v656_v29 }
 0x3b7   :  { %661 = vrot.lane.b32.xlu1 %v659_v31, %s5453_s30 }
 0x405   :  { %v580_v39 = vpop.permute.xlu0 %579 }
 0x406   :  { %v582_v41 = vadd.f32 %v580_v39, %v5630_v24 }
 0x408   :  { %v4357_v43 = vmul.f32 -1.442695, %v582_v41 }
 0x429   :  { %v662_v33 = vpop.permute.xlu1 %661 }
 0x42a   :  { %v664_v34 = vadd.f32 %v662_v33, %v5630_v24 }
 0x42c   :  { %5279 = vtanh.f32 %v664_v34 }
 0x42d   :  { %5281 = vpow2.f32 %v4357_v43 }
 0x439   :  { %v5280_v35 = vpop.eup %5279 }
 0x43a   :  { %v666_v37 = vsub.f32 %v425_v4, %v5280_v35  ;;  %v5282_v44 = vpop.eup %5281 }
 0x43b   :  { %v586_v45 = vadd.f32 1.0, %v5282_v44 }
 0x43c   :  { %668 = vrot.lane.b32.xlu1 %v666_v37, %s5455_s5 }
 0x43d   :  { %5283 = vrcp.f32 %v586_v45 }
 0x44a   :  { %v5284_v46 = vpop.eup %5283 }
 0x4ae   :  { %v669_v47 = vpop.permute.xlu1 %668 }
 0x4af   :  { %v671_v48 = vmul.f32 %v5284_v46, %v669_v47 }
 0x4b1   :  { %673 = vrot.lane.b32.xlu0 %v671_v48, %s5454_s4 }
 0x523   :  { %v674_v50 = vpop.permute.xlu0 %673 }
 0x524   :  { %v676_v51 = vadd.f32 %v5280_v35, %v674_v50 }
 0x526   :  { %678 = vrot.lane.b32.xlu1 %v676_v51, %s5453_s30 }
 0x598   :  { %v5702_v52 = vpop.permute.xlu1 %678 }
 0x599   :  { %4786 = vmatmul.mubr.msk.f32.vlgmr.msra.gmra.mxu0 %vm176_vm2, %v5702_v52  ;;  %4797 = vmatmul.mubr.msk.f32.vlgmr.msra.gmra.mxu1 %vm176_vm2, %v5702_v52 }
 0x59a   :  { %4800 = vmatpush3.msra.mxu0 %v5503_v6  ;;  %4807 = vmatprep.mubr.msk.f32.mxu0 %vm5452_vm1, %v5451_v3 }
 0x59b   :  { %4801 = vmatprep.subr.mxu0 %v5451_v3  ;;  %4811 = vmatpush3.msra.mxu1 %v5486_v2 }
 0x59c   :  { %4802 = vmatpush3.msra.mxu0 %v5533_v11  ;;  %4812 = vmatprep.subr.mxu1 %v5451_v3 }
 0x59d   :  { %4803 = vmatprep.subr.mxu0 %v5451_v3  ;;  %4813 = vmatpush3.msra.mxu1 %v5496_v5 }
 0x59e   :  { %4804 = vmatpush3.msra.mxu0 %v5550_v14  ;;  %4814 = vmatprep.subr.mxu1 %v5451_v3 }
 0x59f   :  { %4805 = vmatprep.subr.mxu0 %v5451_v3  ;;  %4815 = vmatpush3.msra.mxu1 %v5509_v7 }
 0x5a0   :  { %4806 = vmatpush3.msra.mxu0 %v5566_v17  ;;  %4816 = vmatprep.subr.mxu1 %v5451_v3 }
 0x5a1   :  { %4808 = vmatmul.mubr.msk.f32.vlgmr.msra.gmra.mxu0 %vm176_vm2, %v5702_v52  ;;  %4821 = vmatprep.subr.mxu0 %v5451_v3 }
 0x5a2   :  { %4822 = vmatpush3.msra.mxu0 %v5560_v16  ;;  %4817 = vmatpush3.msra.mxu1 %v5525_v10 }
 0x5a3   :  { %4823 = vmatprep.subr.mxu0 %v5451_v3  ;;  %4818 = vmatprep.mubr.msk.f32.mxu1 %vm5452_vm1, %v5451_v3 }
 0x5a4   :  { %4824 = vmatpush3.msra.mxu0 %v5577_v19  ;;  %4829 = vmatprep.mubr.msk.f32.mxu0 %vm5452_vm1, %v5451_v3 }
 0x5a5   :  { %4825 = vmatprep.subr.mxu0 %v5451_v3  ;;  %4832 = vmatprep.subr.mxu1 %v5451_v3 }
 0x5a6   :  { %4826 = vmatpush3.msra.mxu0 %v5586_v20 }
 0x5a7   :  { %4827 = vmatprep.subr.mxu0 %v5451_v3 }
 0x5a8   :  { %4828 = vmatpush3.msra.mxu0 %v5596_v21 }
 0x5a9   :  { %4843 = vmatprep.subr.mxu0 %v5451_v3 }
 0x659   :  { %v748_v24 = vpop.f32.mrf.mxu0  ;;  %v818_v53 = vpop.f32.mrf.mxu1 }
 0x65a   :  { %v822_v54 = vadd.f32 %v748_v24, %v5634_v32  ;;  %830 = vrot.lane.b32.xlu1 %v818_v53, %s5454_s4 }
 0x65b   :  { %v4787_v55 = vpop.f32.mrf.mxu0  ;;  %v4798_v56 = vpop.f32.mrf.mxu1 }
 0x65c   :  { %v4361_v57 = vmul.f32 -1.442695, %v822_v54 }
 0x65e   :  { %5285 = vpow2.f32 %v4361_v57 }
 0x661   :  { %v906_v58 = vpop.f32.mrf.mxu0 }
 0x662   :  { %v907_v62 = vadd.f32 %v5647_v49, %v906_v58 }
 0x663   :  { %v4809_v59 = vpop.f32.mrf.mxu0 }
 0x66b   :  { %v5286_v60 = vpop.eup %5285 }
 0x66c   :  { %v826_v61 = vadd.f32 1.0, %v5286_v60 }
 0x66e   :  { %5287 = vrcp.f32 %v826_v61 }
 0x67b   :  { %v5288_v63 = vpop.eup %5287 }
 0x67c   :  { %v910_v0 = vmul.f32 %v5288_v63, %v907_v62 }
 0x67e   :  { %912 = vrot.lane.b32.xlu0 %v910_v0, %s5453_s30 }
 0x6cc   :  { %v831_v13 = vpop.permute.xlu1 %830 }
 0x6cd   :  { %v833_v15 = vadd.f32 %v831_v13, %v5634_v32 }
 0x6cf   :  { %v4362_v18 = vmul.f32 -1.442695, %v833_v15 }
 0x6f0   :  { %v913_v1 = vpop.permute.xlu0 %912 }
 0x6f1   :  { %v915_v4 = vadd.f32 %v913_v1, %v5634_v32 }
 0x6f3   :  { %5289 = vtanh.f32 %v915_v4 }
 0x6f4   :  { %5291 = vpow2.f32 %v4362_v18 }
 0x700   :  { %v5290_v9 = vpop.eup %5289 }
 0x701   :  { %v917_v12 = vsub.f32 %v676_v51, %v5290_v9  ;;  %v5292_v22 = vpop.eup %5291 }
 0x702   :  { %v837_v23 = vadd.f32 1.0, %v5292_v22 }
 0x703   :  { %919 = vrot.lane.b32.xlu0 %v917_v12, %s5455_s5 }
 0x704   :  { %5293 = vrcp.f32 %v837_v23 }
 0x711   :  { %v5294_v25 = vpop.eup %5293 }
 0x775   :  { %v920_v26 = vpop.permute.xlu0 %919 }
 0x776   :  { %v922_v27 = vmul.f32 %v5294_v25, %v920_v26 }
 0x778   :  { %924 = vrot.lane.b32.xlu1 %v922_v27, %s5454_s4 }
 0x7ea   :  { %v925_v29 = vpop.permute.xlu1 %924 }
 0x7eb   :  { %v927_v30 = vadd.f32 %v5290_v9, %v925_v29 }
 0x7ed   :  { %929 = vrot.lane.b32.xlu0 %v927_v30, %s5453_s30 }
 0x85f   :  { %v5749_v31 = vpop.permute.xlu0 %929 }
 0x860   :  { %4819 = vmatmul.mubr.msk.f32.vlgmr.msra.gmra.mxu1 %vm176_vm2, %v5749_v31  ;;  %4830 = vmatmul.mubr.msk.f32.vlgmr.msra.gmra.mxu0 %vm176_vm2, %v5749_v31 }
 0x861   :  { %4833 = vmatpush3.msra.mxu1 %v5503_v6  ;;  %4840 = vmatprep.mubr.msk.f32.mxu1 %vm5452_vm1, %v5451_v3 }
 0x862   :  { %4834 = vmatprep.subr.mxu1 %v5451_v3  ;;  %4844 = vmatpush3.msra.mxu0 %v5486_v2 }
 0x863   :  { %4835 = vmatpush3.msra.mxu1 %v5533_v11  ;;  %4845 = vmatprep.subr.mxu0 %v5451_v3 }
 0x864   :  { %4836 = vmatprep.subr.mxu1 %v5451_v3  ;;  %4846 = vmatpush3.msra.mxu0 %v5496_v5 }
 0x865   :  { %4837 = vmatpush3.msra.mxu1 %v5550_v14  ;;  %4847 = vmatprep.subr.mxu0 %v5451_v3 }
 0x866   :  { %4838 = vmatprep.subr.mxu1 %v5451_v3  ;;  %4848 = vmatpush3.msra.mxu0 %v5509_v7 }
 0x867   :  { %4839 = vmatpush3.msra.mxu1 %v5566_v17  ;;  %4849 = vmatprep.subr.mxu0 %v5451_v3 }
 0x868   :  { %4841 = vmatmul.mubr.msk.f32.vlgmr.msra.gmra.mxu1 %vm176_vm2, %v5749_v31  ;;  %4854 = vmatprep.subr.mxu1 %v5451_v3 }
 0x869   :  { %4855 = vmatpush3.msra.mxu1 %v5560_v16  ;;  %4850 = vmatpush3.msra.mxu0 %v5525_v10 }
 0x86a   :  { %4856 = vmatprep.subr.mxu1 %v5451_v3  ;;  %4851 = vmatprep.mubr.msk.f32.mxu0 %vm5452_vm1, %v5451_v3 }
 0x86b   :  { %4857 = vmatpush3.msra.mxu1 %v5577_v19  ;;  %4862 = vmatprep.mubr.msk.f32.mxu1 %vm5452_vm1, %v5451_v3 }
 0x86c   :  { %4858 = vmatprep.subr.mxu1 %v5451_v3  ;;  %4865 = vmatprep.subr.mxu0 %v5451_v3 }
 0x86d   :  { %4859 = vmatpush3.msra.mxu1 %v5586_v20 }
 0x86e   :  { %4860 = vmatprep.subr.mxu1 %v5451_v3 }
 0x86f   :  { %4861 = vmatpush3.msra.mxu1 %v5596_v21 }
 0x870   :  { %4876 = vmatprep.subr.mxu1 %v5451_v3 }
 0x920   :  { %v999_v32 = vpop.f32.mrf.mxu1  ;;  %v1069_v33 = vpop.f32.mrf.mxu0 }
 0x921   :  { %v1073_v34 = vadd.f32 %v999_v32, %v5632_v28  ;;  %1081 = vrot.lane.b32.xlu0 %v1069_v33, %s5454_s4 }
 0x922   :  { %v4820_v35 = vpop.f32.mrf.mxu1  ;;  %v4831_v37 = vpop.f32.mrf.mxu0 }
 0x923   :  { %v4366_v39 = vmul.f32 -1.442695, %v1073_v34 }
 0x925   :  { %5295 = vpow2.f32 %v4366_v39 }
 0x928   :  { %v1157_v41 = vpop.f32.mrf.mxu1 }
 0x929   :  { %v1158_v46 = vadd.f32 %v5647_v49, %v1157_v41 }
 0x92a   :  { %v4842_v43 = vpop.f32.mrf.mxu1 }
 0x932   :  { %v5296_v44 = vpop.eup %5295 }
 0x933   :  { %v1077_v45 = vadd.f32 1.0, %v5296_v44 }
 0x935   :  { %5297 = vrcp.f32 %v1077_v45 }
 0x942   :  { %v5298_v47 = vpop.eup %5297 }
 0x943   :  { %v1161_v48 = vmul.f32 %v5298_v47, %v1158_v46 }
 0x945   :  { %1163 = vrot.lane.b32.xlu1 %v1161_v48, %s5453_s30 }
 0x993   :  { %v1082_v54 = vpop.permute.xlu0 %1081 }
 0x994   :  { %v1084_v55 = vadd.f32 %v1082_v54, %v5632_v28 }
 0x996   :  { %v4367_v56 = vmul.f32 -1.442695, %v1084_v55 }
 0x9b7   :  { %v1164_v50 = vpop.permute.xlu1 %1163 }
 0x9b8   :  { %v1166_v51 = vadd.f32 %v1164_v50, %v5632_v28 }
 0x9ba   :  { %5299 = vtanh.f32 %v1166_v51 }
 0x9bb   :  { %5301 = vpow2.f32 %v4367_v56 }
 0x9c7   :  { %v5300_v24 = vpop.eup %5299 }
 0x9c8   :  { %v1168_v53 = vsub.f32 %v927_v30, %v5300_v24  ;;  %v5302_v57 = vpop.eup %5301 }
 0x9c9   :  { %v1088_v58 = vadd.f32 1.0, %v5302_v57 }
 0x9ca   :  { %1170 = vrot.lane.b32.xlu1 %v1168_v53, %s5455_s5 }
 0x9cb   :  { %5303 = vrcp.f32 %v1088_v58 }
 0x9d8   :  { %v5304_v59 = vpop.eup %5303 }
 0xa3c   :  { %v1171_v60 = vpop.permute.xlu1 %1170 }
 0xa3d   :  { %v1173_v61 = vmul.f32 %v5304_v59, %v1171_v60 }
 0xa3f   :  { %1175 = vrot.lane.b32.xlu0 %v1173_v61, %s5454_s4 }
 0xab1   :  { %v1176_v62 = vpop.permute.xlu0 %1175 }
 0xab2   :  { %v1178_v63 = vadd.f32 %v5300_v24, %v1176_v62 }
 0xab4   :  { %1180 = vrot.lane.b32.xlu1 %v1178_v63, %s5453_s30 }
 0xb26   :  { %v5796_v0 = vpop.permute.xlu1 %1180 }
 0xb27   :  { %4852 = vmatmul.mubr.msk.f32.vlgmr.msra.gmra.mxu0 %vm176_vm2, %v5796_v0  ;;  %4863 = vmatmul.mubr.msk.f32.vlgmr.msra.gmra.mxu1 %vm176_vm2, %v5796_v0 }
 0xb28   :  { %4866 = vmatpush3.msra.mxu0 %v5503_v6  ;;  %4873 = vmatprep.mubr.msk.f32.mxu0 %vm5452_vm1, %v5451_v3 }
 0xb29   :  { %4867 = vmatprep.subr.mxu0 %v5451_v3  ;;  %4877 = vmatpush3.msra.mxu1 %v5486_v2 }
 0xb2a   :  { %4868 = vmatpush3.msra.mxu0 %v5533_v11  ;;  %4878 = vmatprep.subr.mxu1 %v5451_v3 }
 0xb2b   :  { %4869 = vmatprep.subr.mxu0 %v5451_v3  ;;  %4879 = vmatpush3.msra.mxu1 %v5496_v5 }
 0xb2c   :  { %4870 = vmatpush3.msra.mxu0 %v5550_v14  ;;  %4880 = vmatprep.subr.mxu1 %v5451_v3 }
 0xb2d   :  { %4871 = vmatprep.subr.mxu0 %v5451_v3  ;;  %4881 = vmatpush3.msra.mxu1 %v5509_v7 }
 0xb2e   :  { %4872 = vmatpush3.msra.mxu0 %v5566_v17  ;;  %4882 = vmatprep.subr.mxu1 %v5451_v3 }
 0xb2f   :  { %4874 = vmatmul.mubr.msk.f32.vlgmr.msra.gmra.mxu0 %vm176_vm2, %v5796_v0  ;;  %4887 = vmatprep.subr.mxu0 %v5451_v3 }
 0xb30   :  { %4888 = vmatpush3.msra.mxu0 %v5560_v16  ;;  %4883 = vmatpush3.msra.mxu1 %v5525_v10 }
 0xb31   :  { %4889 = vmatprep.subr.mxu0 %v5451_v3  ;;  %4884 = vmatprep.mubr.msk.f32.mxu1 %vm5452_vm1, %v5451_v3 }
 0xb32   :  { %4890 = vmatpush3.msra.mxu0 %v5577_v19  ;;  %4895 = vmatprep.mubr.msk.f32.mxu0 %vm5452_vm1, %v5451_v3 }
 0xb33   :  { %4891 = vmatprep.subr.mxu0 %v5451_v3  ;;  %4898 = vmatprep.subr.mxu1 %v5451_v3 }
 0xb34   :  { %4892 = vmatpush3.msra.mxu0 %v5586_v20 }
 0xb35   :  { %4893 = vmatprep.subr.mxu0 %v5451_v3 }
 0xb36   :  { %4894 = vmatpush3.msra.mxu0 %v5596_v21 }
 0xb37   :  { %4909 = vmatprep.subr.mxu0 %v5451_v3 }
 0xbe7   :  { %v1250_v28 = vpop.f32.mrf.mxu0  ;;  %v1320_v1 = vpop.f32.mrf.mxu1 }
 0xbe8   :  { %v1324_v4 = vadd.f32 %v1250_v28, %v5638_v38  ;;  %1332 = vrot.lane.b32.xlu1 %v1320_v1, %s5454_s4 }
 0xbe9   :  { %v4853_v9 = vpop.f32.mrf.mxu0  ;;  %v4864_v12 = vpop.f32.mrf.mxu1 }
 0xbea   :  { %v4371_v13 = vmul.f32 -1.442695, %v1324_v4 }
 0xbec   :  { %5305 = vpow2.f32 %v4371_v13 }
 0xbef   :  { %v1408_v15 = vpop.f32.mrf.mxu0 }
 0xbf0   :  { %v1409_v25 = vadd.f32 %v5647_v49, %v1408_v15 }
 0xbf1   :  { %v4875_v18 = vpop.f32.mrf.mxu0 }
 0xbf9   :  { %v5306_v22 = vpop.eup %5305 }
 0xbfa   :  { %v1328_v23 = vadd.f32 1.0, %v5306_v22 }
 0xbfc   :  { %5307 = vrcp.f32 %v1328_v23 }
 0xc09   :  { %v5308_v26 = vpop.eup %5307 }
 0xc0a   :  { %v1412_v27 = vmul.f32 %v5308_v26, %v1409_v25 }
 0xc0c   :  { %1414 = vrot.lane.b32.xlu0 %v1412_v27, %s5453_s30 }
 0xc5a   :  { %v1333_v34 = vpop.permute.xlu1 %1332 }
 0xc5b   :  { %v1335_v35 = vadd.f32 %v1333_v34, %v5638_v38 }
 0xc5d   :  { %v4372_v37 = vmul.f32 -1.442695, %v1335_v35 }
 0xc7e   :  { %v1415_v29 = vpop.permute.xlu0 %1414 }
 0xc7f   :  { %v1417_v30 = vadd.f32 %v1415_v29, %v5638_v38 }
 0xc81   :  { %5309 = vtanh.f32 %v1417_v30 }
 0xc82   :  { %5311 = vpow2.f32 %v4372_v37 }
 0xc8e   :  { %v5310_v32 = vpop.eup %5309 }
 0xc8f   :  { %v1419_v33 = vsub.f32 %v1178_v63, %v5310_v32  ;;  %v5312_v39 = vpop.eup %5311 }
 0xc90   :  { %v1339_v41 = vadd.f32 1.0, %v5312_v39 }
 0xc91   :  { %1421 = vrot.lane.b32.xlu0 %v1419_v33, %s5455_s5 }
 0xc92   :  { %5313 = vrcp.f32 %v1339_v41 }
 0xc9f   :  { %v5314_v43 = vpop.eup %5313 }
 0xd03   :  { %v1422_v44 = vpop.permute.xlu0 %1421 }
 0xd04   :  { %v1424_v45 = vmul.f32 %v5314_v43, %v1422_v44  ;;  %v2186_v43 = vld [vmem:[%s6414_s2 + $0x18] sm:$0xff] }
 0xd06   :  { %1426 = vrot.lane.b32.xlu1 %v1424_v45, %s5454_s4 }
 0xd78   :  { %v1427_v46 = vpop.permute.xlu1 %1426 }
 0xd79   :  { %v1429_v47 = vadd.f32 %v5310_v32, %v1427_v46 }
 0xd7b   :  { %1431 = vrot.lane.b32.xlu0 %v1429_v47, %s5453_s30 }
 0xded   :  { %v5843_v48 = vpop.permute.xlu0 %1431 }
 0xdee   :  { %4885 = vmatmul.mubr.msk.f32.vlgmr.msra.gmra.mxu1 %vm176_vm2, %v5843_v48  ;;  %4896 = vmatmul.mubr.msk.f32.vlgmr.msra.gmra.mxu0 %vm176_vm2, %v5843_v48 }
 0xdef   :  { %4899 = vmatpush3.msra.mxu1 %v5503_v6  ;;  %4906 = vmatprep.mubr.msk.f32.mxu1 %vm5452_vm1, %v5451_v3 }
 0xdf0   :  { %4900 = vmatprep.subr.mxu1 %v5451_v3  ;;  %4910 = vmatpush3.msra.mxu0 %v5486_v2 }
 0xdf1   :  { %4901 = vmatpush3.msra.mxu1 %v5533_v11  ;;  %4911 = vmatprep.subr.mxu0 %v5451_v3 }
 0xdf2   :  { %4902 = vmatprep.subr.mxu1 %v5451_v3  ;;  %4912 = vmatpush3.msra.mxu0 %v5496_v5 }
 0xdf3   :  { %4903 = vmatpush3.msra.mxu1 %v5550_v14  ;;  %4913 = vmatprep.subr.mxu0 %v5451_v3 }
 0xdf4   :  { %4904 = vmatprep.subr.mxu1 %v5451_v3  ;;  %4914 = vmatpush3.msra.mxu0 %v5509_v7 }
 0xdf5   :  { %4905 = vmatpush3.msra.mxu1 %v5566_v17  ;;  %4915 = vmatprep.subr.mxu0 %v5451_v3 }
 0xdf6   :  { %4907 = vmatmul.mubr.msk.f32.vlgmr.msra.gmra.mxu1 %vm176_vm2, %v5843_v48  ;;  %4920 = vmatprep.subr.mxu1 %v5451_v3 }
 0xdf7   :  { %4921 = vmatpush3.msra.mxu1 %v5560_v16  ;;  %4916 = vmatpush3.msra.mxu0 %v5525_v10 }
 0xdf8   :  { %4922 = vmatprep.subr.mxu1 %v5451_v3  ;;  %4917 = vmatprep.mubr.msk.f32.mxu0 %vm5452_vm1, %v5451_v3 }
 0xdf9   :  { %4923 = vmatpush3.msra.mxu1 %v5577_v19  ;;  %4928 = vmatprep.mubr.msk.f32.mxu1 %vm5452_vm1, %v5451_v3 }
 0xdfa   :  { %4924 = vmatprep.subr.mxu1 %v5451_v3  ;;  %4931 = vmatprep.subr.mxu0 %v5451_v3 }
 0xdfb   :  { %4925 = vmatpush3.msra.mxu1 %v5586_v20 }
 0xdfc   :  { %4926 = vmatprep.subr.mxu1 %v5451_v3 }
 0xdfd   :  { %4927 = vmatpush3.msra.mxu1 %v5596_v21 }
 0xdfe   :  { %4942 = vmatprep.subr.mxu1 %v5451_v3 }
 0xeae   :  { %v1501_v38 = vpop.f32.mrf.mxu1  ;;  %v1571_v50 = vpop.f32.mrf.mxu0 }
 0xeaf   :  { %v1575_v51 = vadd.f32 %v1501_v38, %v5636_v36  ;;  %1583 = vrot.lane.b32.xlu0 %v1571_v50, %s5454_s4  ;;  %v2185_v50 = vld [vmem:[%s6414_s2 + $0x10] sm:$0xff] }
 0xeb0   :  { %v4886_v24 = vpop.f32.mrf.mxu1  ;;  %v4897_v53 = vpop.f32.mrf.mxu0 }
 0xeb1   :  { %v4376_v54 = vmul.f32 -1.442695, %v1575_v51  ;;  %v5425_v51 = vld [vmem:[%s6413_s1 + $0x60] sm:$0xff]  ;;  %v2184_v24 = vld [vmem:[%s6414_s2 + $0x8] sm:$0xff]  ;;  %v5426_v53 = vld [vmem:[%s6413_s1 + $0x58] sm:$0xff] }
 0xeb3   :  { %5315 = vpow2.f32 %v4376_v54  ;;  %v2183_v54 = vld [vmem:[%s6414_s2] sm:$0xff] }
 0xeb6   :  { %v1659_v55 = vpop.f32.mrf.mxu1 }
 0xeb7   :  { %v1660_v59 = vadd.f32 %v5647_v49, %v1659_v55  ;;  %v5427_v55 = vld [vmem:[%s6413_s1 + $0x50] sm:$0xff] }
 0xeb8   :  { %v4908_v56 = vpop.f32.mrf.mxu1 }
 0xeb9   :  { %v5975_v56 = vld [vmem:[%s6414_s2 + $0x38] sm:$0xff] }
 0xec0   :  { %v5316_v57 = vpop.eup %5315 }
 0xec1   :  { %v1579_v58 = vadd.f32 1.0, %v5316_v57  ;;  %v5986_v57 = vld [vmem:[%s6414_s2 + $0x30] sm:$0xff] }
 0xec3   :  { %5317 = vrcp.f32 %v1579_v58 }
 0xed0   :  { %v5318_v60 = vpop.eup %5317 }
 0xed1   :  { %v1663_v61 = vmul.f32 %v5318_v60, %v1660_v59 }
 0xed3   :  { %1665 = vrot.lane.b32.xlu1 %v1663_v61, %s5453_s30 }
 0xf21   :  { %v1584_v4 = vpop.permute.xlu0 %1583 }
 0xf22   :  { %v1586_v9 = vadd.f32 %v1584_v4, %v5636_v36 }
 0xf24   :  { %v4377_v12 = vmul.f32 -1.442695, %v1586_v9 }
 0xf45   :  { %v1666_v62 = vpop.permute.xlu1 %1665 }
 0xf46   :  { %v1668_v63 = vadd.f32 %v1666_v62, %v5636_v36 }
 0xf48   :  { %5319 = vtanh.f32 %v1668_v63 }
 0xf49   :  { %5321 = vpow2.f32 %v4377_v12 }
 0xf55   :  { %v5320_v28 = vpop.eup %5319 }
 0xf56   :  { %v1670_v1 = vsub.f32 %v1429_v47, %v5320_v28  ;;  %v5322_v13 = vpop.eup %5321 }
 0xf57   :  { %v1590_v15 = vadd.f32 1.0, %v5322_v13 }
 0xf58   :  { %1672 = vrot.lane.b32.xlu1 %v1670_v1, %s5455_s5 }
 0xf59   :  { %5323 = vrcp.f32 %v1590_v15 }
 0xf66   :  { %v5324_v18 = vpop.eup %5323 }
 0xfca   :  { %v1673_v22 = vpop.permute.xlu1 %1672 }
 0xfcb   :  { %v1675_v23 = vmul.f32 %v5324_v18, %v1673_v22  ;;  %v6028_v18 = vld [vmem:[%s6414_s2 + $0x58] sm:$0xff]  ;;  %v6033_v22 = vld [vmem:[%s6414_s2 + $0x50] sm:$0xff] }
 0xfcd   :  { %1677 = vrot.lane.b32.xlu0 %v1675_v23, %s5454_s4  ;;  %v6047_v23 = vld [vmem:[%s6414_s2 + $0x40] sm:$0xff] }
0x103f   :  { %v1678_v25 = vpop.permute.xlu0 %1677 }
0x1040   :  { %v1680_v26 = vadd.f32 %v5320_v28, %v1678_v25 }
0x1042   :  { %1682 = vrot.lane.b32.xlu1 %v1680_v26, %s5453_s30 }
0x10b4   :  { %v5890_v27 = vpop.permute.xlu1 %1682 }
0x10b5   :  { %4918 = vmatmul.mubr.msk.f32.vlgmr.msra.gmra.mxu0 %vm176_vm2, %v5890_v27  ;;  %4929 = vmatmul.mubr.msk.f32.vlgmr.msra.gmra.mxu1 %vm176_vm2, %v5890_v27 }
0x10b6   :  { %4932 = vmatpush3.msra.mxu0 %v5503_v6  ;;  %4939 = vmatprep.mubr.msk.f32.mxu0 %vm5452_vm1, %v5451_v3 }
0x10b7   :  { %4933 = vmatprep.subr.mxu0 %v5451_v3  ;;  %4943 = vmatpush3.msra.mxu1 %v5486_v2 }
0x10b8   :  { %4934 = vmatpush3.msra.mxu0 %v5533_v11  ;;  %4944 = vmatprep.subr.mxu1 %v5451_v3 }
0x10b9   :  { %4935 = vmatprep.subr.mxu0 %v5451_v3  ;;  %4945 = vmatpush3.msra.mxu1 %v5496_v5 }
0x10ba   :  { %4936 = vmatpush3.msra.mxu0 %v5550_v14  ;;  %4946 = vmatprep.subr.mxu1 %v5451_v3 }
0x10bb   :  { %4937 = vmatprep.subr.mxu0 %v5451_v3  ;;  %4947 = vmatpush3.msra.mxu1 %v5509_v7 }
0x10bc   :  { %4938 = vmatpush3.msra.mxu0 %v5566_v17  ;;  %4948 = vmatprep.subr.mxu1 %v5451_v3 }
0x10bd   :  { %4940 = vmatmul.mubr.msk.f32.vlgmr.msra.gmra.mxu0 %vm176_vm2, %v5890_v27  ;;  %4953 = vmatprep.subr.mxu0 %v5451_v3 }
0x10be   :  { %4954 = vmatpush3.msra.mxu0 %v5560_v16  ;;  %4949 = vmatpush3.msra.mxu1 %v5525_v10 }
0x10bf   :  { %4955 = vmatprep.subr.mxu0 %v5451_v3  ;;  %4950 = vmatprep.mubr.msk.f32.mxu1 %vm5452_vm1, %v5451_v3 }
0x10c0   :  { %4956 = vmatpush3.msra.mxu0 %v5577_v19  ;;  %4961 = vmatprep.mubr.msk.f32.mxu0 %vm5452_vm1, %v5451_v3 }
0x10c1   :  { %4957 = vmatprep.subr.mxu0 %v5451_v3  ;;  %4964 = vmatprep.subr.mxu1 %v5451_v3 }
0x10c2   :  { %4958 = vmatpush3.msra.mxu0 %v5586_v20 }
0x10c3   :  { %4959 = vmatprep.subr.mxu0 %v5451_v3 }
0x10c4   :  { %4960 = vmatpush3.msra.mxu0 %v5596_v21 }
0x10c5   :  { %4975 = vmatprep.subr.mxu0 %v2186_v43 }
0x1175   :  { %v1752_v2 = vpop.f32.mrf.mxu0  ;;  %v1822_v5 = vpop.f32.mrf.mxu1 }
0x1176   :  { %v1826_v6 = vadd.f32 %v1752_v2, %v5642_v42  ;;  %1834 = vrot.lane.b32.xlu1 %v1822_v5, %s5454_s4 }
0x1177   :  { %v4919_v7 = vpop.f32.mrf.mxu0  ;;  %v4930_v10 = vpop.f32.mrf.mxu1 }
0x1178   :  { %v4381_v11 = vmul.f32 -1.442695, %v1826_v6 }
0x117a   :  { %5325 = vpow2.f32 %v4381_v11 }
0x117d   :  { %v1910_v14 = vpop.f32.mrf.mxu0 }
0x117e   :  { %v1911_v20 = vadd.f32 %v5647_v49, %v1910_v14 }
0x117f   :  { %v4941_v16 = vpop.f32.mrf.mxu0 }
0x1187   :  { %v5326_v17 = vpop.eup %5325 }
0x1188   :  { %v1830_v19 = vadd.f32 1.0, %v5326_v17  ;;  %v6071_v17 = vld [vmem:[%s6414_s2 + $0x78] sm:$0xff] }
0x118a   :  { %5327 = vrcp.f32 %v1830_v19  ;;  %v6076_v19 = vld [vmem:[%s6414_s2 + $0x70] sm:$0xff] }
0x1197   :  { %v5328_v36 = vpop.eup %5327 }
0x1198   :  { %v1914_v29 = vmul.f32 %v5328_v36, %v1911_v20 }
0x119a   :  { %1916 = vrot.lane.b32.xlu0 %v1914_v29, %s5453_s30 }
0x11e8   :  { %v1835_v34 = vpop.permute.xlu1 %1834 }
0x11e9   :  { %v1837_v35 = vadd.f32 %v1835_v34, %v5642_v42 }
0x11eb   :  { %v4382_v37 = vmul.f32 -1.442695, %v1837_v35 }
0x120c   :  { %v1917_v21 = vpop.permute.xlu0 %1916 }
0x120d   :  { %v1919_v30 = vadd.f32 %v1917_v21, %v5642_v42  ;;  %v6093_v21 = vld [vmem:[%s6414_s2 + $0x60] sm:$0xff] }
0x120f   :  { %5329 = vtanh.f32 %v1919_v30 }
0x1210   :  { %5331 = vpow2.f32 %v4382_v37  ;;  %v6118_v37 = vld [vmem:[%s6414_s2 + $0x80] ss:$0 sm:$0xff] }
0x121c   :  { %v5330_v32 = vpop.eup %5329 }
0x121d   :  { %v1921_v33 = vsub.f32 %v1680_v26, %v5330_v32  ;;  %v5332_v39 = vpop.eup %5331 }
0x121e   :  { %v1841_v41 = vadd.f32 1.0, %v5332_v39 }
0x121f   :  { %1923 = vrot.lane.b32.xlu0 %v1921_v33, %s5455_s5 }
0x1220   :  { %5333 = vrcp.f32 %v1841_v41 }
0x122d   :  { %v5334_v44 = vpop.eup %5333 }
0x1291   :  { %v1924_v45 = vpop.permute.xlu0 %1923 }
0x1292   :  { %v1926_v46 = vmul.f32 %v5334_v44, %v1924_v45 }
0x1294   :  { %1928 = vrot.lane.b32.xlu1 %v1926_v46, %s5454_s4 }
0x1306   :  { %v1929_v47 = vpop.permute.xlu1 %1928 }
0x1307   :  { %v5938_v38 = vadd.f32 %v5330_v32, %v1929_v47 }
0x1309   :  { %1933 = vrot.lane.b32.xlu0 %v5938_v38, %s5453_s30 }
0x137b   :  { %v1934_v42 = vpop.permute.xlu0 %1933 }
0x137c   :  { %4951 = vmatmul.mubr.msk.f32.vlgmr.msra.gmra.mxu1 %vm176_vm2, %v1934_v42  ;;  %4962 = vmatmul.mubr.msk.f32.vlgmr.msra.gmra.mxu0 %vm176_vm2, %v1934_v42 }
0x137d   :  { %4965 = vmatpush3.msra.mxu1 %v5425_v51  ;;  %4976 = vmatpush3.msra.mxu0 %v2186_v43 }
0x137e   :  { %4966 = vmatprep.subr.mxu1 %v5451_v3  ;;  %4977 = vmatprep.subr.mxu0 %v2185_v50 }
0x137f   :  { %4983 = vmatprep.mubr.msk.f32.mxu0 %vm176_vm2, %v5655_v8  ;;  %4967 = vmatpush3.msra.mxu1 %v5426_v53  ;;  %v5428_v8 = vld [vmem:[%s6413_s1 + $0x48] sm:$0xff] }
0x1380   :  { %4978 = vmatpush3.msra.mxu0 %v2185_v50  ;;  %4968 = vmatprep.subr.mxu1 %v5451_v3 }
0x1381   :  { %4979 = vmatprep.subr.mxu0 %v2184_v24  ;;  %4969 = vmatpush3.msra.mxu1 %v5427_v55 }
0x1382   :  { %4980 = vmatpush3.msra.mxu0 %v2184_v24  ;;  %4970 = vmatprep.subr.mxu1 %v5451_v3  ;;  %v6137_v24 = vld [vmem:[%s6414_s2 + $0x81] ss:$0 sm:$0xff] }
0x1383   :  { %4981 = vmatprep.subr.mxu0 %v2183_v54  ;;  %4971 = vmatpush3.msra.mxu1 %v5428_v8 }
0x1384   :  { %4972 = vmatprep.mubr.msk.f32.mxu1 %vm5452_vm1, %v5451_v3  ;;  %4982 = vmatpush3.msra.mxu0 %v2183_v54 }
0x1385   :  { %4973 = vmatmul.mubr.msk.f32.vlgmr.msra.gmra.mxu1 %vm176_vm2, %v1934_v42  ;;  %4984 = vmatmul.mubr.msk.f32.vlgmr.msra.gmra.mxu0 %vm176_vm2, %v5702_v52  ;;  %v5995_v52 = vld [vmem:[%s6414_s2 + $0x28] sm:$0xff] }
0x1386   :  { %4995 = vmatprep.subr.mxu1 %v5451_v3  ;;  %4986 = vmatprep.mubr.msk.f32.mxu0 %vm176_vm2, %v5749_v31  ;;  %v6007_v31 = vld [vmem:[%s6414_s2 + $0x20] sm:$0xff] }
0x1387   :  { %4996 = vmatpush3.msra.mxu1 %v5975_v56  ;;  %5003 = vmatprep.mubr.msk.f32.mxu1 %vm5452_vm1, %v5451_v3 }
0x1388   :  { %4997 = vmatprep.subr.mxu1 %v5451_v3  ;;  %5017 = vmatprep.subr.mxu0 %v5451_v3 }
0x1389   :  { %4998 = vmatpush3.msra.mxu1 %v5986_v57  ;;  %4987 = vmatmul.mubr.msk.f32.gmra.mxu0 %vm176_vm2, %v5796_v0 }
0x138a   :  { %4999 = vmatprep.subr.mxu1 %v5451_v3  ;;  %4989 = vmatprep.mubr.msk.f32.mxu0 %vm176_vm2, %v5843_v48 }
0x138b   :  { %5000 = vmatpush3.msra.mxu1 %v5995_v52  ;;  %5018 = vmatpush3.msra.mxu0 %v6071_v17 }
0x138c   :  { %5001 = vmatprep.subr.mxu1 %v5451_v3  ;;  %5019 = vmatprep.subr.mxu0 %v5451_v3 }
0x138d   :  { %5002 = vmatpush3.msra.mxu1 %v6007_v31  ;;  %4990 = vmatmul.mubr.msk.f32.gmra.mxu0 %vm176_vm2, %v5890_v27 }
0x138e   :  { %5004 = vmatmul.mubr.f32.vlgmr.msra.gmra.mxu1 %v5451_v3  ;;  %4992 = vmatprep.mubr.msk.f32.mxu0 %vm176_vm2, %v1934_v42 }
0x138f   :  { %5006 = vmatprep.subr.mxu1 %v5451_v3  ;;  %5014 = vmatprep.mubr.msk.f32.mxu1 %vm5452_vm1, %v5451_v3 }
0x1390   :  { %5007 = vmatpush3.msra.mxu1 %v6028_v18  ;;  %5020 = vmatpush3.msra.mxu0 %v6076_v19 }
0x1391   :  { %5008 = vmatprep.subr.mxu1 %v5451_v3  ;;  %5021 = vmatprep.subr.mxu0 %v5451_v3 }
0x1392   :  { %5009 = vmatpush3.msra.mxu1 %v6033_v22 }
0x1393   :  { %5010 = vmatprep.subr.mxu1 %v5451_v3 }
0x143c   :  { %v2003_v0 = vpop.f32.mrf.mxu1  ;;  %v2073_v48 = vpop.f32.mrf.mxu0 }
0x143d   :  { %v2077_v58 = vadd.f32 %v2003_v0, %v5640_v40  ;;  %2085 = vrot.lane.b32.xlu0 %v2073_v48, %s5454_s4 }
0x143e   :  { %v4952_v59 = vpop.f32.mrf.mxu1  ;;  %v4963_v60 = vpop.f32.mrf.mxu0 }
0x143f   :  { %v4386_v61 = vmul.f32 -1.442695, %v2077_v58 }
0x1441   :  { %5335 = vpow2.f32 %v4386_v61 }
0x1445   :  { %v2161_v62 = vpop.f32.mrf.mxu1  ;;  %v6113_v34 = vpop.f32.mrf.mxu0 }
0x1446   :  { %v2162_v12 = vadd.f32 %v5647_v49, %v2161_v62  ;;  %v6040_v49 = vld [vmem:[%s6414_s2 + $0x48] sm:$0xff] }
0x1447   :  { %v4974_v63 = vpop.f32.mrf.mxu1  ;;  %5011 = vmatpush3.msra.mxu1 %v6040_v49  ;;  %v2280_v35 = vpop.f32.mrf.mxu0 }
0x1448   :  { %5012 = vmatprep.subr.mxu1 %v5451_v3  ;;  %v2281_v39 = vadd.f32 %v6118_v37, %v2280_v35 }
0x1449   :  { %5013 = vmatpush3.msra.mxu1 %v6047_v23  ;;  %v6122_v45 = vpop.f32.mrf.mxu0 }
0x144a   :  { %5015 = vmatmul.mubr.f32.vlgmr.msra.gmra.mxu1 %v5451_v3  ;;  %5028 = vmatprep.subr.mxu1 %v5451_v3 }
0x144b   :  { %5029 = vmatpush3.msra.mxu1 %v5975_v56  ;;  %5036 = vmatprep.mubr.msk.f32.mxu1 %vm5452_vm1, %v5451_v3  ;;  %v6124_v47 = vpop.f32.mrf.mxu0 }
0x144c   :  { %5030 = vmatprep.subr.mxu1 %v5451_v3 }
0x144d   :  { %5031 = vmatpush3.msra.mxu1 %v5986_v57 }
0x144e   :  { %v5336_v28 = vpop.eup %5335  ;;  %v6021_v1 = vpop.f32.mrf.mxu1  ;;  %5032 = vmatprep.subr.mxu1 %v5451_v3 }
0x144f   :  { %v2081_v4 = vadd.f32 1.0, %v5336_v28  ;;  %5033 = vmatpush3.msra.mxu1 %v5995_v52  ;;  %v2459_v41 = vadd.f32 %v6021_v1, %v2281_v39 }
0x1450   :  { %v5005_v9 = vpop.f32.mrf.mxu1  ;;  %5034 = vmatprep.subr.mxu1 %v5451_v3 }
0x1451   :  { %5337 = vrcp.f32 %v2081_v4  ;;  %5035 = vmatpush3.msra.mxu1 %v6007_v31  ;;  %v4399_v43 = vmul.f32 -1.442695, %v2459_v41 }
0x1452   :  { %5050 = vmatprep.subr.mxu1 %v5451_v3 }
0x145e   :  { %v5338_v13 = vpop.eup %5337 }
0x145f   :  { %v2165_v15 = vmul.f32 %v5338_v13, %v2162_v12 }
0x1461   :  { %2167 = vrot.lane.b32.xlu1 %v2165_v15, %s5453_s30 }
0x14af   :  { %v2086_v5 = vpop.permute.xlu0 %2085 }
0x14b0   :  { %v2088_v6 = vadd.f32 %v2086_v5, %v5640_v40 }
0x14b2   :  { %v4387_v7 = vmul.f32 -1.442695, %v2088_v6 }
0x14d3   :  { %v2168_v25 = vpop.permute.xlu1 %2167 }
0x14d4   :  { %v2170_v26 = vadd.f32 %v2168_v25, %v5640_v40  ;;  %v6083_v40 = vld [vmem:[%s6414_s2 + $0x68] sm:$0xff]  ;;  %s5456_s2 = smov [#allocation2]  }
0x14d5   :  { %5022 = vmatpush3.msra.mxu0 %v6083_v40  ;;  %s4334_s1 = sshll.u32 %s5456_s2, 4  ;;  %s4335_s1 = int_to_ptr.vmem [resolvable:$true] %s4334_s1 }
0x14d6   :  { %5339 = vtanh.f32 %v2170_v26  ;;  %5023 = vmatprep.subr.mxu0 %v5451_v3  ;;  %v2286_v26 = vadd.f32 %v6113_v34, %v6118_v37  ;;  %p5434_p1 = scmp.lt.s32.totalorder %s4335_s1, %s4335_s1 }
0x14d7   :  { %5341 = vpow2.f32 %v4387_v7  ;;  %5024 = vmatpush3.msra.mxu0 %v6093_v21 }
0x14d8   :  { %5039 = vmatprep.subr.mxu0 %v5451_v3 }
0x14e3   :  { %v5340_v27 = vpop.eup %5339 }
0x14e4   :  { %v2172_v2 = vsub.f32 %v5938_v38, %v5340_v27  ;;  %v5342_v10 = vpop.eup %5341  ;;  %v6126_v38 = vpop.f32.mrf.mxu0 }
0x14e5   :  { %v2092_v11 = vadd.f32 1.0, %v5342_v10 }
0x14e6   :  { %2174 = vrot.lane.b32.xlu1 %v2172_v2, %s5455_s5  ;;  %v6128_v42 = vpop.f32.mrf.mxu0 }
0x14e7   :  { %5343 = vrcp.f32 %v2092_v11 }
0x14e8   :  { %5345 = vpow2.f32 %v4399_v43 }
0x14f4   :  { %v5344_v20 = vpop.eup %5343 }
0x14f5   :  { %v5346_v44 = vpop.eup %5345 }
0x14f6   :  { %v2463_v46 = vadd.f32 1.0, %v5346_v44 }
0x14f8   :  { %5347 = vrcp.f32 %v2463_v46 }
0x1505   :  { %v5348_v55 = vpop.eup %5347 }
0x150a   :  { %v2455_v14 = vpop.f32.mrf.mxu1 }
0x150c   :  { %v5016_v16 = vpop.f32.mrf.mxu1 }
0x1558   :  { %v2175_v36 = vpop.permute.xlu1 %2174 }
0x1559   :  { %v2177_v29 = vmul.f32 %v5344_v20, %v2175_v36 }
0x155b   :  { %2179 = vrot.lane.b32.xlu0 %v2177_v29, %s5454_s4 }
0x15cd   :  { %v2180_v30 = vpop.permute.xlu0 %2179 }
0x15ce   :  { %v2182_v32 = vadd.f32 %v5340_v27, %v2180_v30 }
0x15d0   :  { %2210 = vrot.lane.b32.xlu1 %v2182_v32, %s5453_s30 }
0x15d4   :  { %2467 = vrot.lane.b32.xlu1 %v2455_v14, %s5454_s4 }
0x1642   :  { %v2211_v33 = vpop.permute.xlu1 %2210 }
0x1643   :  { %4993 = vmatmul.mubr.msk.f32.gmra.mxu0 %vm176_vm2, %v2211_v33 }
0x1644   :  { %5025 = vmatprep.mubr.msk.f32.mxu0 %vm5452_vm1, %v5451_v3 }
0x1646   :  { %v2468_v61 = vpop.permute.xlu1 %2467 }
0x1647   :  { %5026 = vmatmul.mubr.f32.vlgmr.msra.gmra.mxu0 %v5451_v3  ;;  %v2470_v62 = vadd.f32 %v2468_v61, %v2281_v39 }
0x1648   :  { %5040 = vmatpush3.msra.mxu0 %v6028_v18  ;;  %5047 = vmatprep.mubr.msk.f32.mxu0 %vm5452_vm1, %v5451_v3 }
0x1649   :  { %5041 = vmatprep.subr.mxu0 %v5451_v3  ;;  %v4400_v63 = vmul.f32 -1.442695, %v2470_v62 }
0x164a   :  { %5042 = vmatpush3.msra.mxu0 %v6033_v22 }
0x164b   :  { %5043 = vmatprep.subr.mxu0 %v5451_v3 }
0x164c   :  { %5044 = vmatpush3.msra.mxu0 %v6040_v49 }
0x164d   :  { %5045 = vmatprep.subr.mxu0 %v5451_v3 }
0x164e   :  { %5046 = vmatpush3.msra.mxu0 %v6047_v23 }
0x164f   :  { %5061 = vmatprep.subr.mxu0 %v5451_v3 }
0x1703   :  { %v6130_v50 = vpop.f32.mrf.mxu0 }
0x1705   :  { %v6132_v51 = vpop.f32.mrf.mxu0 }
0x1707   :  { %v2543_v53 = vpop.f32.mrf.mxu0 }
0x1708   :  { %v2544_v54 = vadd.f32 %v6137_v24, %v2543_v53 }
0x1709   :  { %v5027_v8 = vpop.f32.mrf.mxu0 }
0x170a   :  { %v2547_v0 = vmul.f32 %v5348_v55, %v2544_v54 }
0x170c   :  { %2549 = vrot.lane.b32.xlu0 %v2547_v0, %s5453_s30 }
0x177e   :  { %v2550_v48 = vpop.permute.xlu0 %2549 }
0x177f   :  { %v2552_v58 = vadd.f32 %v2550_v48, %v2281_v39 }
0x1781   :  { %5349 = vtanh.f32 %v2552_v58  ;;  %v2291_v58 = vadd.f32 %v6118_v37, %v6124_v47 }
0x1782   :  { %5351 = vpow2.f32 %v4400_v63 }
0x178e   :  { %v5350_v59 = vpop.eup %5349 }
0x178f   :  { %v2554_v60 = vsub.f32 0.0, %v5350_v59  ;;  %v5352_v28 = vpop.eup %5351 }
0x1790   :  { %v2474_v1 = vadd.f32 1.0, %v5352_v28 }
0x1791   :  { %2556 = vrot.lane.b32.xlu0 %v2554_v60, %s5455_s5 }
0x1792   :  { %5353 = vrcp.f32 %v2474_v1 }
0x179f   :  { %v5354_v4 = vpop.eup %5353 }
0x1803   :  { %v2557_v9 = vpop.permute.xlu0 %2556 }
0x1804   :  { %v2559_v12 = vmul.f32 %v5354_v4, %v2557_v9 }
0x1806   :  { %2561 = vrot.lane.b32.xlu1 %v2559_v12, %s5454_s4 }
0x1878   :  { %v2562_v13 = vpop.permute.xlu1 %2561 }
0x1879   :  { %v2564_v15 = vadd.f32 %v5350_v59, %v2562_v13 }
0x187b   :  { %2566 = vrot.lane.b32.xlu0 %v2564_v15, %s5453_s30 }
0x18ed   :  { %v2567_v25 = vpop.permute.xlu0 %2566 }
0x18ee   :  { %5037 = vmatmul.mubr.msk.f32.vlgmr.msra.gmra.mxu1 %vm176_vm2, %v2567_v25  ;;  %5048 = vmatmul.mubr.msk.f32.vlgmr.msra.gmra.mxu0 %vm176_vm2, %v2567_v25 }
0x18ef   :  { %5051 = vmatpush3.msra.mxu1 %v6071_v17  ;;  %5058 = vmatprep.mubr.msk.f32.mxu1 %vm5452_vm1, %v5451_v3 }
0x18f0   :  { %5052 = vmatprep.subr.mxu1 %v5451_v3  ;;  %5062 = vmatpush3.msra.mxu0 %v5975_v56 }
0x18f1   :  { %5053 = vmatpush3.msra.mxu1 %v6076_v19  ;;  %5063 = vmatprep.subr.mxu0 %v5451_v3 }
0x18f2   :  { %5054 = vmatprep.subr.mxu1 %v5451_v3  ;;  %5064 = vmatpush3.msra.mxu0 %v5986_v57 }
0x18f3   :  { %5055 = vmatpush3.msra.mxu1 %v6083_v40  ;;  %5065 = vmatprep.subr.mxu0 %v5451_v3 }
0x18f4   :  { %5056 = vmatprep.subr.mxu1 %v5451_v3  ;;  %5066 = vmatpush3.msra.mxu0 %v5995_v52 }
0x18f5   :  { %5057 = vmatpush3.msra.mxu1 %v6093_v21  ;;  %5067 = vmatprep.subr.mxu0 %v5451_v3 }
0x18f6   :  { %5059 = vmatmul.mubr.msk.f32.vlgmr.msra.gmra.mxu1 %vm176_vm2, %v2567_v25  ;;  %5072 = vmatprep.subr.mxu1 %v5451_v3 }
0x18f7   :  { %5073 = vmatpush3.msra.mxu1 %v6028_v18  ;;  %5068 = vmatpush3.msra.mxu0 %v6007_v31 }
0x18f8   :  { %5074 = vmatprep.subr.mxu1 %v5451_v3  ;;  %5069 = vmatprep.mubr.msk.f32.mxu0 %vm5452_vm1, %v5451_v3 }
0x18f9   :  { %5075 = vmatpush3.msra.mxu1 %v6033_v22  ;;  %5080 = vmatprep.mubr.msk.f32.mxu1 %vm5452_vm1, %v5451_v3 }
0x18fa   :  { %5076 = vmatprep.subr.mxu1 %v5451_v3  ;;  %5083 = vmatprep.subr.mxu0 %v5451_v3 }
0x18fb   :  { %5077 = vmatpush3.msra.mxu1 %v6040_v49 }
0x18fc   :  { %5078 = vmatprep.subr.mxu1 %v5451_v3 }
0x18fd   :  { %5079 = vmatpush3.msra.mxu1 %v6047_v23 }
0x18fe   :  { %5094 = vmatprep.subr.mxu1 %v5451_v3 }
0x19ae   :  { %v2636_v27 = vpop.f32.mrf.mxu1  ;;  %v2706_v2 = vpop.f32.mrf.mxu0 }
0x19af   :  { %v2710_v5 = vadd.f32 %v2636_v27, %v2286_v26  ;;  %2718 = vrot.lane.b32.xlu0 %v2706_v2, %s5454_s4 }
0x19b0   :  { %v5038_v6 = vpop.f32.mrf.mxu1  ;;  %v5049_v7 = vpop.f32.mrf.mxu0 }
0x19b1   :  { %v4403_v10 = vmul.f32 -1.442695, %v2710_v5 }
0x19b3   :  { %5355 = vpow2.f32 %v4403_v10 }
0x19b6   :  { %v2794_v11 = vpop.f32.mrf.mxu1 }
0x19b7   :  { %v2795_v36 = vadd.f32 %v6137_v24, %v2794_v11 }
0x19b8   :  { %v5060_v14 = vpop.f32.mrf.mxu1 }
0x19c0   :  { %v5356_v16 = vpop.eup %5355 }
0x19c1   :  { %v2714_v20 = vadd.f32 1.0, %v5356_v16 }
0x19c3   :  { %5357 = vrcp.f32 %v2714_v20 }
0x19d0   :  { %v5358_v29 = vpop.eup %5357 }
0x19d1   :  { %v2798_v30 = vmul.f32 %v5358_v29, %v2795_v36 }
0x19d3   :  { %2800 = vrot.lane.b32.xlu1 %v2798_v30, %s5453_s30 }
0x1a21   :  { %v2719_v39 = vpop.permute.xlu0 %2718 }
0x1a22   :  { %v2721_v41 = vadd.f32 %v2719_v39, %v2286_v26 }
0x1a24   :  { %v4404_v43 = vmul.f32 -1.442695, %v2721_v41 }
0x1a45   :  { %v2801_v32 = vpop.permute.xlu1 %2800 }
0x1a46   :  { %v2803_v33 = vadd.f32 %v2801_v32, %v2286_v26  ;;  %v2296_v32 = vadd.f32 %v6122_v45, %v6118_v37 }
0x1a48   :  { %5359 = vtanh.f32 %v2803_v33 }
0x1a49   :  { %5361 = vpow2.f32 %v4404_v43 }
0x1a55   :  { %v5360_v34 = vpop.eup %5359 }
0x1a56   :  { %v2805_v35 = vsub.f32 %v2564_v15, %v5360_v34  ;;  %v5362_v44 = vpop.eup %5361 }
0x1a57   :  { %v2725_v46 = vadd.f32 1.0, %v5362_v44 }
0x1a58   :  { %2807 = vrot.lane.b32.xlu1 %v2805_v35, %s5455_s5 }
0x1a59   :  { %5363 = vrcp.f32 %v2725_v46 }
0x1a66   :  { %v5364_v53 = vpop.eup %5363 }
0x1aca   :  { %v2808_v54 = vpop.permute.xlu1 %2807 }
0x1acb   :  { %v2810_v55 = vmul.f32 %v5364_v53, %v2808_v54 }
0x1acd   :  { %2812 = vrot.lane.b32.xlu0 %v2810_v55, %s5454_s4 }
0x1b3f   :  { %v2813_v8 = vpop.permute.xlu0 %2812 }
0x1b40   :  { %v2815_v0 = vadd.f32 %v5360_v34, %v2813_v8 }
0x1b42   :  { %2817 = vrot.lane.b32.xlu1 %v2815_v0, %s5453_s30 }
0x1bb4   :  { %v2818_v48 = vpop.permute.xlu1 %2817 }
0x1bb5   :  { %5070 = vmatmul.mubr.msk.f32.vlgmr.msra.gmra.mxu0 %vm176_vm2, %v2818_v48  ;;  %5081 = vmatmul.mubr.msk.f32.vlgmr.msra.gmra.mxu1 %vm176_vm2, %v2818_v48 }
0x1bb6   :  { %5084 = vmatpush3.msra.mxu0 %v6071_v17  ;;  %5091 = vmatprep.mubr.msk.f32.mxu0 %vm5452_vm1, %v5451_v3 }
0x1bb7   :  { %5085 = vmatprep.subr.mxu0 %v5451_v3  ;;  %5095 = vmatpush3.msra.mxu1 %v5975_v56 }
0x1bb8   :  { %5086 = vmatpush3.msra.mxu0 %v6076_v19  ;;  %5096 = vmatprep.subr.mxu1 %v5451_v3 }
0x1bb9   :  { %5087 = vmatprep.subr.mxu0 %v5451_v3  ;;  %5097 = vmatpush3.msra.mxu1 %v5986_v57 }
0x1bba   :  { %5088 = vmatpush3.msra.mxu0 %v6083_v40  ;;  %5098 = vmatprep.subr.mxu1 %v5451_v3 }
0x1bbb   :  { %5089 = vmatprep.subr.mxu0 %v5451_v3  ;;  %5099 = vmatpush3.msra.mxu1 %v5995_v52 }
0x1bbc   :  { %5090 = vmatpush3.msra.mxu0 %v6093_v21  ;;  %5100 = vmatprep.subr.mxu1 %v5451_v3 }
0x1bbd   :  { %5092 = vmatmul.mubr.msk.f32.vlgmr.msra.gmra.mxu0 %vm176_vm2, %v2818_v48  ;;  %5105 = vmatprep.subr.mxu0 %v5451_v3 }
0x1bbe   :  { %5106 = vmatpush3.msra.mxu0 %v6028_v18  ;;  %5101 = vmatpush3.msra.mxu1 %v6007_v31 }
0x1bbf   :  { %5107 = vmatprep.subr.mxu0 %v5451_v3  ;;  %5102 = vmatprep.mubr.msk.f32.mxu1 %vm5452_vm1, %v5451_v3 }
0x1bc0   :  { %5108 = vmatpush3.msra.mxu0 %v6033_v22  ;;  %5113 = vmatprep.mubr.msk.f32.mxu0 %vm5452_vm1, %v5451_v3 }
0x1bc1   :  { %5109 = vmatprep.subr.mxu0 %v5451_v3  ;;  %5116 = vmatprep.subr.mxu1 %v5451_v3 }
0x1bc2   :  { %5110 = vmatpush3.msra.mxu0 %v6040_v49 }
0x1bc3   :  { %5111 = vmatprep.subr.mxu0 %v5451_v3 }
0x1bc4   :  { %5112 = vmatpush3.msra.mxu0 %v6047_v23 }
0x1bc5   :  { %5127 = vmatprep.subr.mxu0 %v5451_v3 }
0x1c75   :  { %v2887_v59 = vpop.f32.mrf.mxu0  ;;  %v2957_v60 = vpop.f32.mrf.mxu1 }
0x1c76   :  { %v2961_v61 = vadd.f32 %v2887_v59, %v2291_v58  ;;  %2969 = vrot.lane.b32.xlu1 %v2957_v60, %s5454_s4 }
0x1c77   :  { %v5071_v62 = vpop.f32.mrf.mxu0  ;;  %v5082_v63 = vpop.f32.mrf.mxu1 }
0x1c78   :  { %v4408_v28 = vmul.f32 -1.442695, %v2961_v61 }
0x1c7a   :  { %5365 = vpow2.f32 %v4408_v28 }
0x1c7d   :  { %v3045_v1 = vpop.f32.mrf.mxu0 }
0x1c7e   :  { %v3046_v13 = vadd.f32 %v6137_v24, %v3045_v1 }
0x1c7f   :  { %v5093_v4 = vpop.f32.mrf.mxu0 }
0x1c87   :  { %v5366_v9 = vpop.eup %5365 }
0x1c88   :  { %v2965_v12 = vadd.f32 1.0, %v5366_v9 }
0x1c8a   :  { %5367 = vrcp.f32 %v2965_v12 }
0x1c97   :  { %v5368_v15 = vpop.eup %5367 }
0x1c98   :  { %v3049_v25 = vmul.f32 %v5368_v15, %v3046_v13 }
0x1c9a   :  { %3051 = vrot.lane.b32.xlu0 %v3049_v25, %s5453_s30  ;;  %v2301_v25 = vadd.f32 %v6118_v37, %v6128_v42 }
0x1ce8   :  { %v2970_v5 = vpop.permute.xlu1 %2969 }
0x1ce9   :  { %v2972_v6 = vadd.f32 %v2970_v5, %v2291_v58 }
0x1ceb   :  { %v4409_v7 = vmul.f32 -1.442695, %v2972_v6 }
0x1d0c   :  { %v3052_v47 = vpop.permute.xlu0 %3051 }
0x1d0d   :  { %v3054_v26 = vadd.f32 %v3052_v47, %v2291_v58 }
0x1d0f   :  { %5369 = vtanh.f32 %v3054_v26 }
0x1d10   :  { %5371 = vpow2.f32 %v4409_v7 }
0x1d1c   :  { %v5370_v27 = vpop.eup %5369 }
0x1d1d   :  { %v3056_v2 = vsub.f32 %v2815_v0, %v5370_v27  ;;  %v5372_v10 = vpop.eup %5371 }
0x1d1e   :  { %v2976_v11 = vadd.f32 1.0, %v5372_v10 }
0x1d1f   :  { %3058 = vrot.lane.b32.xlu0 %v3056_v2, %s5455_s5 }
0x1d20   :  { %5373 = vrcp.f32 %v2976_v11 }
0x1d2d   :  { %v5374_v14 = vpop.eup %5373 }
0x1d91   :  { %v3059_v16 = vpop.permute.xlu0 %3058 }
0x1d92   :  { %v3061_v20 = vmul.f32 %v5374_v14, %v3059_v16 }
0x1d94   :  { %3063 = vrot.lane.b32.xlu1 %v3061_v20, %s5454_s4 }
0x1e06   :  { %v3064_v36 = vpop.permute.xlu1 %3063 }
0x1e07   :  { %v3066_v29 = vadd.f32 %v5370_v27, %v3064_v36 }
0x1e09   :  { %3068 = vrot.lane.b32.xlu0 %v3066_v29, %s5453_s30 }
0x1e7b   :  { %v3069_v30 = vpop.permute.xlu0 %3068 }
0x1e7c   :  { %5103 = vmatmul.mubr.msk.f32.vlgmr.msra.gmra.mxu1 %vm176_vm2, %v3069_v30  ;;  %5114 = vmatmul.mubr.msk.f32.vlgmr.msra.gmra.mxu0 %vm176_vm2, %v3069_v30 }
0x1e7d   :  { %5117 = vmatpush3.msra.mxu1 %v6071_v17  ;;  %5124 = vmatprep.mubr.msk.f32.mxu1 %vm5452_vm1, %v5451_v3 }
0x1e7e   :  { %5118 = vmatprep.subr.mxu1 %v5451_v3  ;;  %5128 = vmatpush3.msra.mxu0 %v5975_v56 }
0x1e7f   :  { %5119 = vmatpush3.msra.mxu1 %v6076_v19  ;;  %5129 = vmatprep.subr.mxu0 %v5451_v3 }
0x1e80   :  { %5120 = vmatprep.subr.mxu1 %v5451_v3  ;;  %5130 = vmatpush3.msra.mxu0 %v5986_v57 }
0x1e81   :  { %5121 = vmatpush3.msra.mxu1 %v6083_v40  ;;  %5131 = vmatprep.subr.mxu0 %v5451_v3 }
0x1e82   :  { %5122 = vmatprep.subr.mxu1 %v5451_v3  ;;  %5132 = vmatpush3.msra.mxu0 %v5995_v52 }
0x1e83   :  { %5123 = vmatpush3.msra.mxu1 %v6093_v21  ;;  %5133 = vmatprep.subr.mxu0 %v5451_v3 }
0x1e84   :  { %5125 = vmatmul.mubr.msk.f32.vlgmr.msra.gmra.mxu1 %vm176_vm2, %v3069_v30  ;;  %5138 = vmatprep.subr.mxu1 %v5451_v3 }
0x1e85   :  { %5139 = vmatpush3.msra.mxu1 %v6028_v18  ;;  %5134 = vmatpush3.msra.mxu0 %v6007_v31 }
0x1e86   :  { %5140 = vmatprep.subr.mxu1 %v5451_v3  ;;  %5135 = vmatprep.mubr.msk.f32.mxu0 %vm5452_vm1, %v5451_v3 }
0x1e87   :  { %5141 = vmatpush3.msra.mxu1 %v6033_v22  ;;  %5146 = vmatprep.mubr.msk.f32.mxu1 %vm5452_vm1, %v5451_v3 }
0x1e88   :  { %5142 = vmatprep.subr.mxu1 %v5451_v3  ;;  %5149 = vmatprep.subr.mxu0 %v5451_v3 }
0x1e89   :  { %5143 = vmatpush3.msra.mxu1 %v6040_v49 }
0x1e8a   :  { %5144 = vmatprep.subr.mxu1 %v5451_v3 }
0x1e8b   :  { %5145 = vmatpush3.msra.mxu1 %v6047_v23 }
0x1e8c   :  { %5160 = vmatprep.subr.mxu1 %v5451_v3 }
0x1f3c   :  { %v3138_v33 = vpop.f32.mrf.mxu1  ;;  %v3208_v34 = vpop.f32.mrf.mxu0 }
0x1f3d   :  { %v3212_v35 = vadd.f32 %v3138_v33, %v2296_v32  ;;  %3220 = vrot.lane.b32.xlu0 %v3208_v34, %s5454_s4 }
0x1f3e   :  { %v5104_v39 = vpop.f32.mrf.mxu1  ;;  %v5115_v41 = vpop.f32.mrf.mxu0 }
0x1f3f   :  { %v4413_v43 = vmul.f32 -1.442695, %v3212_v35 }
0x1f41   :  { %5375 = vpow2.f32 %v4413_v43 }
0x1f44   :  { %v3296_v44 = vpop.f32.mrf.mxu1 }
0x1f45   :  { %v3297_v55 = vadd.f32 %v6137_v24, %v3296_v44 }
0x1f46   :  { %v5126_v46 = vpop.f32.mrf.mxu1 }
0x1f4e   :  { %v5376_v53 = vpop.eup %5375 }
0x1f4f   :  { %v3216_v54 = vadd.f32 1.0, %v5376_v53 }
0x1f51   :  { %5377 = vrcp.f32 %v3216_v54 }
0x1f5e   :  { %v5378_v8 = vpop.eup %5377 }
0x1f5f   :  { %v3300_v0 = vmul.f32 %v5378_v8, %v3297_v55  ;;  %v2306_v8 = vadd.f32 %v6126_v38, %v6118_v37 }
0x1f61   :  { %3302 = vrot.lane.b32.xlu1 %v3300_v0, %s5453_s30 }
0x1faf   :  { %v3221_v60 = vpop.permute.xlu0 %3220 }
0x1fb0   :  { %v3223_v61 = vadd.f32 %v3221_v60, %v2296_v32 }
0x1fb2   :  { %v4414_v62 = vmul.f32 -1.442695, %v3223_v61 }
0x1fd3   :  { %v3303_v45 = vpop.permute.xlu1 %3302 }
0x1fd4   :  { %v3305_v48 = vadd.f32 %v3303_v45, %v2296_v32 }
0x1fd6   :  { %5379 = vtanh.f32 %v3305_v48 }
0x1fd7   :  { %5381 = vpow2.f32 %v4414_v62 }
0x1fe3   :  { %v5380_v58 = vpop.eup %5379 }
0x1fe4   :  { %v3307_v59 = vsub.f32 %v3066_v29, %v5380_v58  ;;  %v5382_v63 = vpop.eup %5381 }
0x1fe5   :  { %v3227_v28 = vadd.f32 1.0, %v5382_v63 }
0x1fe6   :  { %3309 = vrot.lane.b32.xlu1 %v3307_v59, %s5455_s5 }
0x1fe7   :  { %5383 = vrcp.f32 %v3227_v28 }
0x1ff4   :  { %v5384_v1 = vpop.eup %5383 }
0x2058   :  { %v3310_v4 = vpop.permute.xlu1 %3309 }
0x2059   :  { %v3312_v9 = vmul.f32 %v5384_v1, %v3310_v4 }
0x205b   :  { %3314 = vrot.lane.b32.xlu0 %v3312_v9, %s5454_s4 }
0x20cd   :  { %v3315_v12 = vpop.permute.xlu0 %3314 }
0x20ce   :  { %v3317_v13 = vadd.f32 %v5380_v58, %v3315_v12 }
0x20d0   :  { %3319 = vrot.lane.b32.xlu1 %v3317_v13, %s5453_s30 }
0x2142   :  { %v3320_v15 = vpop.permute.xlu1 %3319 }
0x2143   :  { %5136 = vmatmul.mubr.msk.f32.vlgmr.msra.gmra.mxu0 %vm176_vm2, %v3320_v15  ;;  %5147 = vmatmul.mubr.msk.f32.vlgmr.msra.gmra.mxu1 %vm176_vm2, %v3320_v15 }
0x2144   :  { %5150 = vmatpush3.msra.mxu0 %v6071_v17  ;;  %5157 = vmatprep.mubr.msk.f32.mxu0 %vm5452_vm1, %v5451_v3 }
0x2145   :  { %5151 = vmatprep.subr.mxu0 %v5451_v3  ;;  %5161 = vmatpush3.msra.mxu1 %v5975_v56 }
0x2146   :  { %5152 = vmatpush3.msra.mxu0 %v6076_v19  ;;  %5162 = vmatprep.subr.mxu1 %v5451_v3 }
0x2147   :  { %5153 = vmatprep.subr.mxu0 %v5451_v3  ;;  %5163 = vmatpush3.msra.mxu1 %v5986_v57 }
0x2148   :  { %5154 = vmatpush3.msra.mxu0 %v6083_v40  ;;  %5164 = vmatprep.subr.mxu1 %v5451_v3 }
0x2149   :  { %5155 = vmatprep.subr.mxu0 %v5451_v3  ;;  %5165 = vmatpush3.msra.mxu1 %v5995_v52 }
0x214a   :  { %5156 = vmatpush3.msra.mxu0 %v6093_v21  ;;  %5166 = vmatprep.subr.mxu1 %v5451_v3 }
0x214b   :  { %5158 = vmatmul.mubr.msk.f32.vlgmr.msra.gmra.mxu0 %vm176_vm2, %v3320_v15  ;;  %5171 = vmatprep.subr.mxu0 %v5451_v3 }
0x214c   :  { %5172 = vmatpush3.msra.mxu0 %v6028_v18  ;;  %5167 = vmatpush3.msra.mxu1 %v6007_v31 }
0x214d   :  { %5173 = vmatprep.subr.mxu0 %v5451_v3  ;;  %5168 = vmatprep.mubr.msk.f32.mxu1 %vm5452_vm1, %v5451_v3 }
0x214e   :  { %5174 = vmatpush3.msra.mxu0 %v6033_v22  ;;  %5179 = vmatprep.mubr.msk.f32.mxu0 %vm5452_vm1, %v5451_v3 }
0x214f   :  { %5175 = vmatprep.subr.mxu0 %v5451_v3  ;;  %5182 = vmatprep.subr.mxu1 %v5451_v3 }
0x2150   :  { %5176 = vmatpush3.msra.mxu0 %v6040_v49 }
0x2151   :  { %5177 = vmatprep.subr.mxu0 %v5451_v3 }
0x2152   :  { %5178 = vmatpush3.msra.mxu0 %v6047_v23 }
0x2153   :  { %5193 = vmatprep.subr.mxu0 %v5451_v3 }
0x2203   :  { %v3389_v47 = vpop.f32.mrf.mxu0  ;;  %v3459_v26 = vpop.f32.mrf.mxu1 }
0x2204   :  { %v3463_v27 = vadd.f32 %v3389_v47, %v2301_v25  ;;  %3471 = vrot.lane.b32.xlu1 %v3459_v26, %s5454_s4 }
0x2205   :  { %v5137_v2 = vpop.f32.mrf.mxu0  ;;  %v5148_v5 = vpop.f32.mrf.mxu1 }
0x2206   :  { %v4418_v6 = vmul.f32 -1.442695, %v3463_v27 }
0x2208   :  { %5385 = vpow2.f32 %v4418_v6 }
0x220b   :  { %v3547_v7 = vpop.f32.mrf.mxu0 }
0x220c   :  { %v3548_v16 = vadd.f32 %v6137_v24, %v3547_v7 }
0x220d   :  { %v5159_v10 = vpop.f32.mrf.mxu0 }
0x2215   :  { %v5386_v11 = vpop.eup %5385 }
0x2216   :  { %v3467_v14 = vadd.f32 1.0, %v5386_v11 }
0x2218   :  { %5387 = vrcp.f32 %v3467_v14 }
0x2225   :  { %v5388_v20 = vpop.eup %5387 }
0x2226   :  { %v3551_v36 = vmul.f32 %v5388_v20, %v3548_v16 }
0x2228   :  { %3553 = vrot.lane.b32.xlu0 %v3551_v36, %s5453_s30 }
0x2276   :  { %v3472_v33 = vpop.permute.xlu1 %3471 }
0x2277   :  { %v3474_v34 = vadd.f32 %v3472_v33, %v2301_v25 }
0x2279   :  { %v4419_v35 = vmul.f32 -1.442695, %v3474_v34 }
0x229a   :  { %v3554_v42 = vpop.permute.xlu0 %3553 }
0x229b   :  { %v3556_v29 = vadd.f32 %v3554_v42, %v2301_v25 }
0x229d   :  { %5389 = vtanh.f32 %v3556_v29 }
0x229e   :  { %5391 = vpow2.f32 %v4419_v35 }
0x22aa   :  { %v5390_v30 = vpop.eup %5389 }
0x22ab   :  { %v3558_v32 = vsub.f32 %v3317_v13, %v5390_v30  ;;  %v5392_v39 = vpop.eup %5391 }
0x22ac   :  { %v3478_v41 = vadd.f32 1.0, %v5392_v39 }
0x22ad   :  { %3560 = vrot.lane.b32.xlu0 %v3558_v32, %s5455_s5 }
0x22ae   :  { %5393 = vrcp.f32 %v3478_v41 }
0x22bb   :  { %v5394_v43 = vpop.eup %5393 }
0x231f   :  { %v3561_v44 = vpop.permute.xlu0 %3560 }
0x2320   :  { %v3563_v46 = vmul.f32 %v5394_v43, %v3561_v44 }
0x2322   :  { %3565 = vrot.lane.b32.xlu1 %v3563_v46, %s5454_s4 }
0x2394   :  { %v3566_v53 = vpop.permute.xlu1 %3565 }
0x2395   :  { %v3568_v54 = vadd.f32 %v5390_v30, %v3566_v53 }
0x2397   :  { %3570 = vrot.lane.b32.xlu0 %v3568_v54, %s5453_s30 }
0x2409   :  { %v3571_v55 = vpop.permute.xlu0 %3570 }
0x240a   :  { %5169 = vmatmul.mubr.msk.f32.vlgmr.msra.gmra.mxu1 %vm176_vm2, %v3571_v55  ;;  %5180 = vmatmul.mubr.msk.f32.vlgmr.msra.gmra.mxu0 %vm176_vm2, %v3571_v55 }
0x240b   :  { %5183 = vmatpush3.msra.mxu1 %v6071_v17  ;;  %5190 = vmatprep.mubr.msk.f32.mxu1 %vm5452_vm1, %v5451_v3 }
0x240c   :  { %5184 = vmatprep.subr.mxu1 %v5451_v3  ;;  %5194 = vmatpush3.msra.mxu0 %v5975_v56 }
0x240d   :  { %5185 = vmatpush3.msra.mxu1 %v6076_v19  ;;  %5195 = vmatprep.subr.mxu0 %v5451_v3 }
0x240e   :  { %5186 = vmatprep.subr.mxu1 %v5451_v3  ;;  %5196 = vmatpush3.msra.mxu0 %v5986_v57 }
0x240f   :  { %5187 = vmatpush3.msra.mxu1 %v6083_v40  ;;  %5197 = vmatprep.subr.mxu0 %v5451_v3 }
0x2410   :  { %5188 = vmatprep.subr.mxu1 %v5451_v3  ;;  %5198 = vmatpush3.msra.mxu0 %v5995_v52 }
0x2411   :  { %5189 = vmatpush3.msra.mxu1 %v6093_v21  ;;  %5199 = vmatprep.subr.mxu0 %v5451_v3 }
0x2412   :  { %5191 = vmatmul.mubr.msk.f32.vlgmr.msra.gmra.mxu1 %vm176_vm2, %v3571_v55  ;;  %5204 = vmatprep.subr.mxu1 %v5451_v3 }
0x2413   :  { %5205 = vmatpush3.msra.mxu1 %v6028_v18  ;;  %5200 = vmatpush3.msra.mxu0 %v6007_v31 }
0x2414   :  { %5206 = vmatprep.subr.mxu1 %v5451_v3  ;;  %5201 = vmatprep.mubr.msk.f32.mxu0 %vm5452_vm1, %v5451_v3 }
0x2415   :  { %5207 = vmatpush3.msra.mxu1 %v6033_v22  ;;  %5212 = vmatprep.mubr.msk.f32.mxu1 %vm5452_vm1, %v5451_v3 }
0x2416   :  { %5208 = vmatprep.subr.mxu1 %v5451_v3  ;;  %5215 = vmatprep.subr.mxu0 %v5451_v3 }
0x2417   :  { %5209 = vmatpush3.msra.mxu1 %v6040_v49 }
0x2418   :  { %5210 = vmatprep.subr.mxu1 %v5451_v3 }
0x2419   :  { %5211 = vmatpush3.msra.mxu1 %v6047_v23 }
0x241a   :  { %5226 = vmatprep.subr.mxu1 %v5451_v3 }
0x24ca   :  { %v3640_v0 = vpop.f32.mrf.mxu1  ;;  %v3710_v45 = vpop.f32.mrf.mxu0 }
0x24cb   :  { %v3714_v48 = vadd.f32 %v3640_v0, %v2306_v8  ;;  %3722 = vrot.lane.b32.xlu0 %v3710_v45, %s5454_s4 }
0x24cc   :  { %v5170_v58 = vpop.f32.mrf.mxu1  ;;  %v5181_v59 = vpop.f32.mrf.mxu0 }
0x24cd   :  { %v4423_v60 = vmul.f32 -1.442695, %v3714_v48 }
0x24cf   :  { %5395 = vpow2.f32 %v4423_v60 }
0x24d2   :  { %v3798_v61 = vpop.f32.mrf.mxu1 }
0x24d3   :  { %v3799_v1 = vadd.f32 %v6137_v24, %v3798_v61 }
0x24d4   :  { %v5192_v62 = vpop.f32.mrf.mxu1 }
0x24dc   :  { %v5396_v63 = vpop.eup %5395 }
0x24dd   :  { %v3718_v28 = vadd.f32 1.0, %v5396_v63 }
0x24df   :  { %5397 = vrcp.f32 %v3718_v28 }
0x24ec   :  { %v5398_v4 = vpop.eup %5397 }
0x24ed   :  { %v3802_v9 = vmul.f32 %v5398_v4, %v3799_v1 }
0x24ef   :  { %3804 = vrot.lane.b32.xlu1 %v3802_v9, %s5453_s30 }
0x253d   :  { %v3723_v25 = vpop.permute.xlu0 %3722 }
0x253e   :  { %v3725_v47 = vadd.f32 %v3723_v25, %v2306_v8 }
0x2540   :  { %v4424_v26 = vmul.f32 -1.442695, %v3725_v47 }
0x2561   :  { %v3805_v38 = vpop.permute.xlu1 %3804 }
0x2562   :  { %v3807_v12 = vadd.f32 %v3805_v38, %v2306_v8 }
0x2564   :  { %5399 = vtanh.f32 %v3807_v12 }
0x2565   :  { %5401 = vpow2.f32 %v4424_v26 }
0x2571   :  { %v5400_v13 = vpop.eup %5399 }
0x2572   :  { %v3809_v15 = vsub.f32 %v3568_v54, %v5400_v13  ;;  %v5402_v27 = vpop.eup %5401 }
0x2573   :  { %v3729_v2 = vadd.f32 1.0, %v5402_v27 }
0x2574   :  { %3811 = vrot.lane.b32.xlu1 %v3809_v15, %s5455_s5 }
0x2575   :  { %5403 = vrcp.f32 %v3729_v2 }
0x2582   :  { %v5404_v5 = vpop.eup %5403 }
0x25e6   :  { %v3812_v6 = vpop.permute.xlu1 %3811 }
0x25e7   :  { %v3814_v7 = vmul.f32 %v5404_v5, %v3812_v6 }
0x25e9   :  { %3816 = vrot.lane.b32.xlu0 %v3814_v7, %s5454_s4 }
0x265b   :  { %v3817_v10 = vpop.permute.xlu0 %3816 }
0x265c   :  { %v3819_v11 = vadd.f32 %v5400_v13, %v3817_v10 }
0x265e   :  { %3821 = vrot.lane.b32.xlu1 %v3819_v11, %s5453_s30 }
0x26d0   :  { %v3822_v14 = vpop.permute.xlu1 %3821 }
0x26d1   :  { %5202 = vmatmul.mubr.msk.f32.vlgmr.msra.gmra.mxu0 %vm176_vm2, %v3822_v14  ;;  %5213 = vmatmul.mubr.msk.f32.vlgmr.msra.gmra.mxu1 %vm176_vm2, %v3822_v14 }
0x26d2   :  { %5216 = vmatpush3.msra.mxu0 %v6071_v17  ;;  %5223 = vmatprep.mubr.msk.f32.mxu0 %vm5452_vm1, %v5451_v3 }
0x26d3   :  { %5217 = vmatprep.subr.mxu0 %v5451_v3  ;;  %5227 = vmatpush3.msra.mxu1 %v5975_v56  ;;  %v2311_v56 = vadd.f32 %v6118_v37, %v6132_v51 }
0x26d4   :  { %5218 = vmatpush3.msra.mxu0 %v6076_v19  ;;  %5228 = vmatprep.subr.mxu1 %v5451_v3 }
0x26d5   :  { %5219 = vmatprep.subr.mxu0 %v5451_v3  ;;  %5229 = vmatpush3.msra.mxu1 %v5986_v57 }
0x26d6   :  { %5220 = vmatpush3.msra.mxu0 %v6083_v40  ;;  %5230 = vmatprep.subr.mxu1 %v5451_v3 }
0x26d7   :  { %5221 = vmatprep.subr.mxu0 %v5451_v3  ;;  %5231 = vmatpush3.msra.mxu1 %v5995_v52 }
0x26d8   :  { %5222 = vmatpush3.msra.mxu0 %v6093_v21  ;;  %5232 = vmatprep.subr.mxu1 %v5451_v3 }
0x26d9   :  { %5224 = vmatmul.mubr.msk.f32.vlgmr.msra.gmra.mxu0 %vm176_vm2, %v3822_v14  ;;  %5237 = vmatprep.subr.mxu0 %v5451_v3 }
0x26da   :  { %5238 = vmatpush3.msra.mxu0 %v6028_v18  ;;  %5233 = vmatpush3.msra.mxu1 %v6007_v31 }
0x26db   :  { %5239 = vmatprep.subr.mxu0 %v5451_v3  ;;  %5234 = vmatprep.mubr.msk.f32.mxu1 %vm5452_vm1, %v5451_v3 }
0x26dc   :  { %5240 = vmatpush3.msra.mxu0 %v6033_v22  ;;  %5245 = vmatprep.mubr.msk.f32.mxu0 %vm5452_vm1, %v5451_v3 }
0x26dd   :  { %5241 = vmatprep.subr.mxu0 %v5451_v3  ;;  %5248 = vmatprep.subr.mxu1 %v5451_v3 }
0x26de   :  { %5242 = vmatpush3.msra.mxu0 %v6040_v49 }
0x26df   :  { %5243 = vmatprep.subr.mxu0 %v5451_v3 }
0x26e0   :  { %5244 = vmatpush3.msra.mxu0 %v6047_v23 }
0x2791   :  { %v3891_v57 = vpop.f32.mrf.mxu0  ;;  %v3961_v52 = vpop.f32.mrf.mxu1 }
0x2792   :  { %v3965_v31 = vadd.f32 %v3891_v57, %v2311_v56  ;;  %3973 = vrot.lane.b32.xlu1 %v3961_v52, %s5454_s4 }
0x2793   :  { %v5203_v18 = vpop.f32.mrf.mxu0  ;;  %v5214_v22 = vpop.f32.mrf.mxu1 }
0x2794   :  { %v4428_v16 = vmul.f32 -1.442695, %v3965_v31 }
0x2796   :  { %5405 = vpow2.f32 %v4428_v16 }
0x2799   :  { %v4049_v20 = vpop.f32.mrf.mxu0 }
0x279a   :  { %v4050_v29 = vadd.f32 %v6137_v24, %v4049_v20 }
0x279b   :  { %v5225_v36 = vpop.f32.mrf.mxu0 }
0x27a3   :  { %v5406_v42 = vpop.eup %5405 }
0x27a4   :  { %v3969_v49 = vadd.f32 1.0, %v5406_v42 }
0x27a6   :  { %5407 = vrcp.f32 %v3969_v49 }
0x27b3   :  { %v5408_v23 = vpop.eup %5407 }
0x27b4   :  { %v4053_v30 = vmul.f32 %v5408_v23, %v4050_v29 }
0x27b6   :  { %4055 = vrot.lane.b32.xlu0 %v4053_v30, %s5453_s30 }
0x2804   :  { %v3974_v35 = vpop.permute.xlu1 %3973 }
0x2805   :  { %v3976_v39 = vadd.f32 %v3974_v35, %v2311_v56 }
0x2807   :  { %v4429_v41 = vmul.f32 -1.442695, %v3976_v39 }
0x2828   :  { %v4056_v51 = vpop.permute.xlu0 %4055 }
0x2829   :  { %v4058_v32 = vadd.f32 %v4056_v51, %v2311_v56 }
0x282b   :  { %5409 = vtanh.f32 %v4058_v32 }
0x282c   :  { %5411 = vpow2.f32 %v4429_v41 }
0x2838   :  { %v5410_v33 = vpop.eup %5409 }
0x2839   :  { %v4060_v34 = vsub.f32 %v3819_v11, %v5410_v33  ;;  %v5412_v43 = vpop.eup %5411 }
0x283a   :  { %v3980_v44 = vadd.f32 1.0, %v5412_v43 }
0x283b   :  { %4062 = vrot.lane.b32.xlu0 %v4060_v34, %s5455_s5 }
0x283c   :  { %5413 = vrcp.f32 %v3980_v44 }
0x2849   :  { %v5414_v46 = vpop.eup %5413 }
0x28ad   :  { %v4063_v53 = vpop.permute.xlu0 %4062 }
0x28ae   :  { %v4065_v54 = vmul.f32 %v5414_v46, %v4063_v53 }
0x28b0   :  { %4067 = vrot.lane.b32.xlu1 %v4065_v54, %s5454_s4 }
0x2922   :  { %v4068_v55 = vpop.permute.xlu1 %4067 }
0x2923   :  { %v4070_v8 = vadd.f32 %v5410_v33, %v4068_v55 }
0x2925   :  { %4072 = vrot.lane.b32.xlu0 %v4070_v8, %s5453_s30 }
0x2997   :  { %v4073_v0 = vpop.permute.xlu0 %4072 }
0x2998   :  { %5235 = vmatmul.mubr.msk.f32.vlgmr.msra.gmra.mxu1 %vm176_vm2, %v4073_v0  ;;  %5246 = vmatmul.mubr.msk.f32.vlgmr.msra.gmra.mxu0 %vm176_vm2, %v4073_v0 }
0x2999   :  { %5249 = vmatpush3.msra.mxu1 %v6071_v17  ;;  %5256 = vmatprep.mubr.msk.f32.mxu1 %vm5452_vm1, %v5451_v3  ;;  %v2316_v17 = vadd.f32 %v6130_v50, %v6118_v37 }
0x299a   :  { %5250 = vmatprep.subr.mxu1 %v5451_v3 }
0x299b   :  { %5251 = vmatpush3.msra.mxu1 %v6076_v19 }
0x299c   :  { %5252 = vmatprep.subr.mxu1 %v5451_v3 }
0x299d   :  { %5253 = vmatpush3.msra.mxu1 %v6083_v40 }
0x299e   :  { %5254 = vmatprep.subr.mxu1 %v5451_v3 }
0x299f   :  { %5255 = vmatpush3.msra.mxu1 %v6093_v21 }
0x29a0   :  { %5257 = vmatmul.mubr.msk.f32.vlgmr.msra.gmra.mxu1 %vm176_vm2, %v4073_v0 }
0x2a58   :  { %v4142_v45 = vpop.f32.mrf.mxu1  ;;  %v4212_v48 = vpop.f32.mrf.mxu0 }
0x2a59   :  { %v4216_v58 = vadd.f32 %v4142_v45, %v2316_v17  ;;  %4224 = vrot.lane.b32.xlu0 %v4212_v48, %s5454_s4 }
0x2a5a   :  { %v5236_v59 = vpop.f32.mrf.mxu1  ;;  %v5247_v19 = vpop.f32.mrf.mxu0 }
0x2a5b   :  { %v4433_v60 = vmul.f32 -1.442695, %v4216_v58 }
0x2a5d   :  { %5415 = vpow2.f32 %v4433_v60 }
0x2a60   :  { %v4300_v61 = vpop.f32.mrf.mxu1 }
0x2a61   :  { %v4301_v21 = vadd.f32 %v6137_v24, %v4300_v61 }
0x2a62   :  { %v5258_v40 = vpop.f32.mrf.mxu1 }
0x2a6a   :  { %v5416_v62 = vpop.eup %5415 }
0x2a6b   :  { %v4220_v3 = vadd.f32 1.0, %v5416_v62 }
0x2a6d   :  { %5417 = vrcp.f32 %v4220_v3 }
0x2a7a   :  { %v5418_v63 = vpop.eup %5417 }
0x2a7b   :  { %v4304_v28 = vmul.f32 %v5418_v63, %v4301_v21 }
0x2a7d   :  { %4306 = vrot.lane.b32.xlu1 %v4304_v28, %s5453_s30 }
0x2acb   :  { %v4225_v9 = vpop.permute.xlu0 %4224 }
0x2acc   :  { %v4227_v38 = vadd.f32 %v4225_v9, %v2316_v17 }
0x2ace   :  { %v4434_v12 = vmul.f32 -1.442695, %v4227_v38 }
0x2aef   :  { %v4307_v37 = vpop.permute.xlu1 %4306 }
0x2af0   :  { %v4309_v50 = vadd.f32 %v4307_v37, %v2316_v17 }
0x2af2   :  { %5419 = vtanh.f32 %v4309_v50 }
0x2af3   :  { %5421 = vpow2.f32 %v4434_v12 }
0x2aff   :  { %v5420_v1 = vpop.eup %5419 }
0x2b00   :  { %v4311_v4 = vsub.f32 %v4070_v8, %v5420_v1  ;;  %v5422_v13 = vpop.eup %5421 }
0x2b01   :  { %v4231_v15 = vadd.f32 1.0, %v5422_v13 }
0x2b02   :  { %4313 = vrot.lane.b32.xlu1 %v4311_v4, %s5455_s5  ;;  %s5429_s5 = scalar_lea.vmem %s4335_s1, 32 }
0x2b03   :  { %5423 = vrcp.f32 %v4231_v15  ;;  %p5430_p0 = scmp.ne.s32.totalorder %s4335_s1, %s5429_s5  ;;  %p5435_p2 = scmp.lt.s32.totalorder %s5429_s5, %s5429_s5 }
0x2b05   :  { %p5436_p3 = por %p5435_p2, %p5434_p1 }
0x2b07   :  { %p5437_p4 = pnand %p5436_p3, %p5430_p0 }
0x2b10   :  { %v5424_v25 = vpop.eup %5423 }
0x2b74   :  { %v4314_v24 = vpop.permute.xlu1 %4313 }
0x2b75   :  { %v4316_v47 = vmul.f32 %v5424_v25, %v4314_v24 }
0x2b77   :  { %4318 = vrot.lane.b32.xlu0 %v4316_v47, %s5454_s4 }
0x2be9   :  { %v4319_v26 = vpop.permute.xlu0 %4318 }
0x2bea   :  { %v4321_v27 = vadd.f32 %v5420_v1, %v4319_v26 }
0x2bec   :  { %4323 = vrot.lane.b32.xlu1 %v4321_v27, %s5453_s30 }
0x2c5e   :  { %v4324_v2 = vpop.permute.xlu1 %4323 }
0x2c5f   :  { %4327 = vst.msk [vmem:[#allocation2] sm:$0x3] %vm4326_vm3, %v4324_v2 }
0x2c60   :  { %5440 = shalt.err (!%p5437_p4)
}
0x2c61   :  { %4337 = dma.vmem_to_hbm [thread:$0]  %s4335_s1, 32, %s6415_s3, [#allocation3]  }
0x2c62   :  { %5449 = dma.done.wait [#allocation3], 32  }
0x2c63   :  { %5450 = vsyncadd [#allocation3], 4294967264 }
0x2c64   :  { %4341 = vsyncpa [#allocation3], 1 }

</bundles_post_ra>
